<compile_context>
chip_gen: v5e
topology: v5e:2x2
jax: 0.10.0
libtpu: 0.0.40
codegen_flags: <defaults>
</compile_context>

<pallas_src>
import jax
import jax.numpy as jnp
from jax import lax
from jax.experimental import pallas as pl
from jax.experimental.pallas import tpu as pltpu

EPS = 1e-5  # PyTorch LayerNorm default


# ----------------------------- shared helpers -----------------------------

def _layernorm(x, gamma, beta):
    mu = jnp.mean(x, axis=-1, keepdims=True)
    var = jnp.mean((x - mu) ** 2, axis=-1, keepdims=True)
    return (x - mu) * lax.rsqrt(var + EPS) * gamma + beta


def _sigmoid_fast(x):
    # f32 1/(1+exp(-x)) is overflow-safe; approx reciprocal runs on the EUP slot.
    return pl.reciprocal(1.0 + jnp.exp(-x), approx=True)


# ------------------------------- fused kernel -------------------------------

def fused_encoder_kernel(emb_ref, ew_ref, biaspos_ref, cmask_ref,
                         wi_ref, wdt_ref, wo_ref, vec_ref, fln_ref,
                         out_ref, x_scr):
    """Whole encoder for one batch tile; grid = (B // TB, num_layers)."""
    layer = pl.program_id(1)
    n_layers = pl.num_programs(1)

    M, H = x_scr.shape                 # M = TB * L
    DI = wdt_ref.shape[1]

    # ---- front: embed_proj + (bias + positional encoding), first layer step only
    @pl.when(layer == 0)
    def _():
        y = jnp.dot(emb_ref[...], ew_ref[...], preferred_element_type=jnp.float32)
        x_scr[...] = y + biaspos_ref[...]

    x = x_scr[...]                     # (M, H) f32 residual stream

    # packed per-layer vectors: rows = [ln_gamma, ln_beta, dt_bias, wc0, wc1, wc2]
    vec = vec_ref[0]                   # (8, W)
    ln_g = vec[0:1, :H]
    ln_b = vec[1:2, :H]
    bdt = vec[2:3, :DI]
    wc0 = vec[3:4, :DI]
    wc1 = vec[4:5, :DI]
    wc2 = vec[5:6, :DI]

    # ---- LayerNorm + fused in_proj (single (H, 2*DI) matmul, static split)
    xn = _layernorm(x, ln_g, ln_b).astype(jnp.bfloat16)
    xp = jnp.dot(xn, wi_ref[0], preferred_element_type=jnp.float32)   # (M, 2*DI)
    x1 = xp[:, :DI]
    x2 = xp[:, DI:]

    # ---- depthwise Conv1d(k=3, pad=1) along time via XLU rolls + per-seq edge masks
    prev = cmask_ref[:, 0:1] * pltpu.roll(x1, shift=1, axis=0)        # x1[t-1]
    nxt = cmask_ref[:, 1:2] * pltpu.roll(x1, shift=M - 1, axis=0)     # x1[t+1]
    x1_conv = wc0 * prev + wc1 * x1 + wc2 * nxt

    # ---- SiLU / dt gate / x2 gate (f32, divides on EUP)
    x1_ssm = x1_conv * _sigmoid_fast(x1_conv)
    dt = jnp.dot(x1_ssm.astype(jnp.bfloat16), wdt_ref[0],
                 preferred_element_type=jnp.float32) + bdt
    # sigmoid(softplus(dt)) == 1 - 1/(2 + exp(dt)), overflow-safe
    gate_dt = 1.0 - pl.reciprocal(2.0 + jnp.exp(dt), approx=True)
    x_gated = x1_ssm * gate_dt * _sigmoid_fast(x2)

    # ---- out_proj (layer_scale pre-folded into the weight) + residual
    out = jnp.dot(x_gated.astype(jnp.bfloat16), wo_ref[0],
                  preferred_element_type=jnp.float32)
    x_new = out + x
    x_scr[...] = x_new

    # ---- final LayerNorm + store, last layer only
    @pl.when(layer == n_layers - 1)
    def _():
        out_ref[...] = _layernorm(x_new, fln_ref[0:1, :],
                                  fln_ref[1:2, :]).astype(out_ref.dtype)


# --------------------------------- wrapper ----------------------------------

def _pick_batch_tile(B, L, target_rows=256, max_rows=1024):
    """Smallest divisor of B whose fold reaches target_rows MXU rows (cap max_rows)."""
    best = 1
    for tb in range(1, B + 1):
        if B % tb != 0:
            continue
        if tb * L > max_rows:
            break
        best = tb
        if tb * L >= target_rows:
            break
    return best


def _vmem_limit_bytes(TBL, E, H, DI, W):
    bf, f4 = 2, 4
    per_layer = (H * 2 * DI + DI * DI + DI * H) * bf + 8 * W * f4
    resident = (TBL * E * bf + E * H * bf + TBL * H * f4 + TBL * 2 * f4
                + 2 * H * f4 + TBL * H * f4)
    scratch = TBL * H * f4
    temps = 10 * TBL * DI * f4
    need = 2 * per_layer + 2 * resident + scratch + temps
    return int(min(max(2 * need, 32 << 20), 48 << 20))


def encoder_forward(tokens, params, return_sequence=True):
    # embedding gather (data-dependent) stays in plain JAX; cast to bf16 up front.
    emb = params["embedding"][tokens].astype(jnp.bfloat16)       # (B, L, E)
    B, L, E = emb.shape
    H = params["embed_w"].shape[1]
    st = params["stacked"]
    num_layers, _, d_inner = st["wdt"].shape
    W = st["vec"].shape[-1]

    TB = _pick_batch_tile(B, L)
    TBL = TB * L
    grid = (B // TB, num_layers)

    emb_flat = emb.reshape(B * L, E)

    # bias + positional encoding folded and tiled per sequence in the batch tile
    pos = params["pos_encoding"][0, :L, :]                        # (L, H)
    biaspos = jnp.tile(params["embed_b"] + pos, (TB, 1))          # (TBL, H) f32

    # per-sequence conv edge masks (col 0: has-prev, col 1: has-next)
    ridx = jnp.arange(TBL)
    cmask = jnp.stack([(ridx % L != 0), (ridx % L != (L - 1))],
                      axis=1).astype(jnp.float32)                 # (TBL, 2)

    fln = jnp.concatenate([params["final_gamma"], params["final_beta"]], axis=0)  # (2, H)

    in_specs = [
        pl.BlockSpec((TBL, E), lambda b, l: (b, 0)),              # emb (bf16)
        pl.BlockSpec((E, H), lambda b, l: (0, 0)),                # embed_w (bf16)
        pl.BlockSpec((TBL, H), lambda b, l: (0, 0)),              # bias+pos (f32)
        pl.BlockSpec((TBL, 2), lambda b, l: (0, 0)),              # conv masks (f32)
        pl.BlockSpec((1, H, 2 * d_inner), lambda b, l: (l, 0, 0)),  # fused in_proj (bf16)
        pl.BlockSpec((1, d_inner, d_inner), lambda b, l: (l, 0, 0)),  # dt_proj (bf16)
        pl.BlockSpec((1, d_inner, H), lambda b, l: (l, 0, 0)),    # out_proj*scale (bf16)
        pl.BlockSpec((1, 8, W), lambda b, l: (l, 0, 0)),          # packed vectors (f32)
        pl.BlockSpec((2, H), lambda b, l: (0, 0)),                # final LN gamma/beta
    ]

    out_flat = pl.pallas_call(
        fused_encoder_kernel,
        out_shape=jax.ShapeDtypeStruct((B * L, H), jnp.float32),
        grid=grid,
        in_specs=in_specs,
        out_specs=pl.BlockSpec((TBL, H), lambda b, l: (b, 0)),
        scratch_shapes=[pltpu.VMEM((TBL, H), jnp.float32)],
        compiler_params=pltpu.CompilerParams(
            dimension_semantics=("parallel", "arbitrary"),
            vmem_limit_bytes=_vmem_limit_bytes(TBL, E, H, d_inner, W)),
    )(emb_flat, params["embed_w"], biaspos, cmask,
      st["wi"], st["wdt"], st["wo"], st["vec"], fln)

    out = out_flat.reshape(B, L, H)
    if return_sequence:
        return out
    return jnp.mean(out, axis=1)


# ------------------------- pure-JAX reference --------------------------------

def _softplus_ref(x):
    # matches torch.nn.functional.softplus (beta=1, threshold=20)
    return jnp.where(x > 20.0, x, jnp.log1p(jnp.exp(jnp.minimum(x, 20.0))))


def ref_forward(tokens, params):
    emb = params["embedding"][tokens].astype(jnp.bfloat16)
    L = tokens.shape[1]
    x = jnp.dot(emb, params["embed_w"], preferred_element_type=jnp.float32)
    x = x + params["embed_b"] + params["pos_encoding"][:, :L, :]
    st = params["stacked"]
    DI = st["wdt"].shape[-1]
    for l in range(st["wi"].shape[0]):
        lp = {k: v[l] for k, v in st.items() if k != "vec"}
        xn = _layernorm(x, lp["ln_gamma"], lp["ln_beta"]).astype(jnp.bfloat16)
        xp = jnp.dot(xn, lp["wi"], preferred_element_type=jnp.float32)
        x1, x2 = xp[..., :DI], xp[..., DI:]
        x1p = jnp.pad(x1, ((0, 0), (1, 1), (0, 0)))
        wc = lp["wc"]
        x1_conv = wc[0] * x1p[:, :-2] + wc[1] * x1p[:, 1:-1] + wc[2] * x1p[:, 2:]
        x1_ssm = x1_conv * jax.nn.sigmoid(x1_conv)
        dt = jnp.dot(x1_ssm.astype(jnp.bfloat16), lp["wdt"],
                     preferred_element_type=jnp.float32) + lp["bdt"]
        x_gated = x1_ssm * jax.nn.sigmoid(_softplus_ref(dt)) * jax.nn.sigmoid(x2)
        x = jnp.dot(x_gated.astype(jnp.bfloat16), lp["wo"],
                    preferred_element_type=jnp.float32) + x
    return _layernorm(x, params["final_gamma"], params["final_beta"])


# ------------------------------- params --------------------------------------

def init_params(key, vocab_size, embed_dim, hidden_dim, num_layers, expand_factor):
    d_inner = int(hidden_dim * expand_factor)
    W = max(hidden_dim, d_inner)
    keys = iter(jax.random.split(key, 4 + 6 * num_layers))
    f32, bf16 = jnp.float32, jnp.bfloat16

    params = {
        "embedding": jax.random.normal(next(keys), (vocab_size, embed_dim), f32),
        "embed_w": (jax.random.normal(next(keys), (embed_dim, hidden_dim), f32)
                    / jnp.sqrt(embed_dim)).astype(bf16),
        "embed_b": jax.random.normal(next(keys), (1, hidden_dim), f32) * 0.01,
        "pos_encoding": jax.random.normal(next(keys), (1, 2048, hidden_dim), f32) * 0.02,
        "final_gamma": jnp.ones((1, hidden_dim), f32),
        "final_beta": jnp.zeros((1, hidden_dim), f32),
    }

    ln_g, ln_b, wi, wc, wdt, bdt, wo = ([] for _ in range(7))
    for _ in range(num_layers):
        ln_g.append(jnp.ones((hidden_dim,), f32))
        ln_b.append(jnp.zeros((hidden_dim,), f32))
        w1 = jax.random.normal(next(keys), (hidden_dim, d_inner), f32) / jnp.sqrt(hidden_dim)
        w2 = jax.random.normal(next(keys), (hidden_dim, d_inner), f32) / jnp.sqrt(hidden_dim)
        wi.append(jnp.concatenate([w1, w2], axis=1).astype(bf16))   # fused in_proj (H, 2*DI)
        wc.append(jax.random.normal(next(keys), (3, d_inner), f32) * 0.3)
        wdt.append((jax.random.normal(next(keys), (d_inner, d_inner), f32)
                    / jnp.sqrt(d_inner)).astype(bf16))
        bdt.append(jax.random.normal(next(keys), (d_inner,), f32) * 0.01)
        w_o = jax.random.normal(next(keys), (d_inner, hidden_dim), f32) / jnp.sqrt(d_inner)
        wo.append((w_o * 0.1).astype(bf16))        # layer_scale (0.1) folded into out_proj

    st = {
        "ln_gamma": jnp.stack(ln_g), "ln_beta": jnp.stack(ln_b),
        "wi": jnp.stack(wi), "wc": jnp.stack(wc),
        "wdt": jnp.stack(wdt), "bdt": jnp.stack(bdt), "wo": jnp.stack(wo),
    }
    # pack the small per-layer vectors into one (num_layers, 8, W) array
    vec = jnp.zeros((num_layers, 8, W), f32)
    vec = vec.at[:, 0, :hidden_dim].set(st["ln_gamma"])
    vec = vec.at[:, 1, :hidden_dim].set(st["ln_beta"])
    vec = vec.at[:, 2, :d_inner].set(st["bdt"])
    vec = vec.at[:, 3:6, :d_inner].set(st["wc"])
    st["vec"] = vec
    params["stacked"] = st
    return params


# --------------------------------- main ---------------------------------------

if __name__ == "__main__":
    VOCAB, EMBED, HIDDEN, NUM_LAYERS, EXPAND = 64, 64, 128, 2, 2.0
    B, L = 2, 16

    key = jax.random.PRNGKey(0)
    k_tok, k_par = jax.random.split(key)
    tokens = jax.random.randint(k_tok, (B, L), 0, VOCAB, dtype=jnp.int32)
    params = init_params(k_par, VOCAB, EMBED, HIDDEN, NUM_LAYERS, EXPAND)

    out = jax.block_until_ready(encoder_forward(tokens, params, return_sequence=True))
    ref = jax.block_until_ready(ref_forward(tokens, params))

    assert out.shape == (B, L, HIDDEN)
    max_err = float(jnp.max(jnp.abs(out - ref)))
    # tolerance covers bf16 MXU matmuls + EUP approx reciprocals in the gates
    assert max_err < 1e-2, f"mismatch vs reference: {max_err}"

    print("KERNEL_OK")
</pallas_src>

<mosaic_0001>
module attributes {stable_mosaic.version = 11 : i64} {
  func.func @fused_encoder_kernel(%arg0: i32, %arg1: i32, %arg2: memref<32x64xbf16, #tpu.memory_space<vmem>>, %arg3: memref<64x128xbf16, #tpu.memory_space<vmem>>, %arg4: memref<32x128xf32, #tpu.memory_space<vmem>>, %arg5: memref<32x2xf32, #tpu.memory_space<vmem>>, %arg6: memref<1x128x512xbf16, #tpu.memory_space<vmem>>, %arg7: memref<1x256x256xbf16, #tpu.memory_space<vmem>>, %arg8: memref<1x256x128xbf16, #tpu.memory_space<vmem>>, %arg9: memref<1x8x256xf32, #tpu.memory_space<vmem>>, %arg10: memref<2x128xf32, #tpu.memory_space<vmem>>, %arg11: memref<32x128xf32, #tpu.memory_space<vmem>>, %arg12: memref<32x128xf32, #tpu.memory_space<vmem>>) attributes {dimension_semantics = [#tpu.dimension_semantics<parallel>, #tpu.dimension_semantics<arbitrary>], iteration_bounds = array<i64: 1, 2>, scalar_prefetch = 0 : i64, scratch_operands = 1 : i64, tpu.core_type = #tpu.core_type<tc>, window_params = [{transform_indices = @transform_0, window_bounds = array<i64: 32, 64>}, {pipeline_mode = #tpu.pipeline_mode<synchronous>, transform_indices = @transform_1, window_bounds = array<i64: 64, 128>}, {pipeline_mode = #tpu.pipeline_mode<synchronous>, transform_indices = @transform_2, window_bounds = array<i64: 32, 128>}, {pipeline_mode = #tpu.pipeline_mode<synchronous>, transform_indices = @transform_3, window_bounds = array<i64: 32, 2>}, {transform_indices = @transform_4, window_bounds = array<i64: 1, 128, 512>}, {transform_indices = @transform_5, window_bounds = array<i64: 1, 256, 256>}, {transform_indices = @transform_6, window_bounds = array<i64: 1, 256, 128>}, {transform_indices = @transform_7, window_bounds = array<i64: 1, 8, 256>}, {pipeline_mode = #tpu.pipeline_mode<synchronous>, transform_indices = @transform_8, window_bounds = array<i64: 2, 128>}, {transform_indices = @transform_9, window_bounds = array<i64: 32, 128>}]} {
    %c0_i32 = arith.constant 0 : i32
    %0 = arith.cmpi eq, %arg1, %c0_i32 : i32
    %1 = arith.extui %0 : i1 to i32
    %c0_i32_0 = arith.constant 0 : i32
    %2 = arith.cmpi ne, %1, %c0_i32_0 : i32
    scf.if %2 {
      %c0_34 = arith.constant 0 : index
      %c0_35 = arith.constant 0 : index
      %92 = vector.load %arg2[%c0_34, %c0_35] : memref<32x64xbf16, #tpu.memory_space<vmem>>, vector<32x64xbf16>
      %c0_36 = arith.constant 0 : index
      %c0_37 = arith.constant 0 : index
      %93 = vector.load %arg3[%c0_36, %c0_37] : memref<64x128xbf16, #tpu.memory_space<vmem>>, vector<64x128xbf16>
      %cst_38 = arith.constant dense<0.000000e+00> : vector<32x128xf32>
      %94 = tpu.matmul %92, %93, %cst_38 {dimension_numbers = #tpu.dot_dimension_numbers<[1], [0], [0], [1], [0, 0, 1, 1], [], []>} : vector<32x64xbf16>, vector<64x128xbf16>, vector<32x128xf32> -> vector<32x128xf32>
      %c0_39 = arith.constant 0 : index
      %c0_40 = arith.constant 0 : index
      %95 = vector.load %arg4[%c0_39, %c0_40] : memref<32x128xf32, #tpu.memory_space<vmem>>, vector<32x128xf32>
      %96 = arith.addf %94, %95 : vector<32x128xf32>
      %c0_41 = arith.constant 0 : index
      %c0_42 = arith.constant 0 : index
      %97 = vector.load %arg12[%c0_41, %c0_42] : memref<32x128xf32, #tpu.memory_space<vmem>>, vector<32x128xf32>
      tpu.vector_store %arg12[%c0_41, %c0_42], %96 {strides = array<i32>} : memref<32x128xf32, #tpu.memory_space<vmem>>, vector<32x128xf32>,
    } else {
    }
    %c0 = arith.constant 0 : index
    %c0_1 = arith.constant 0 : index
    %3 = vector.load %arg12[%c0, %c0_1] : memref<32x128xf32, #tpu.memory_space<vmem>>, vector<32x128xf32>
    %c0_2 = arith.constant 0 : index
    %c0_3 = arith.constant 0 : index
    %c0_4 = arith.constant 0 : index
    %4 = vector.load %arg9[%c0_2, %c0_3, %c0_4] : memref<1x8x256xf32, #tpu.memory_space<vmem>>, vector<1x8x256xf32>
    %5 = vector.shape_cast %4 : vector<1x8x256xf32> to vector<8x256xf32>
    %6 = vector.extract_strided_slice %5 {offsets = [0, 0], sizes = [1, 128], strides = [1, 1]} : vector<8x256xf32> to vector<1x128xf32>
    %7 = vector.extract_strided_slice %5 {offsets = [1, 0], sizes = [1, 128], strides = [1, 1]} : vector<8x256xf32> to vector<1x128xf32>
    %8 = vector.extract_strided_slice %5 {offsets = [2, 0], sizes = [1, 256], strides = [1, 1]} : vector<8x256xf32> to vector<1x256xf32>
    %9 = vector.extract_strided_slice %5 {offsets = [3, 0], sizes = [1, 256], strides = [1, 1]} : vector<8x256xf32> to vector<1x256xf32>
    %10 = vector.extract_strided_slice %5 {offsets = [4, 0], sizes = [1, 256], strides = [1, 1]} : vector<8x256xf32> to vector<1x256xf32>
    %11 = vector.extract_strided_slice %5 {offsets = [5, 0], sizes = [1, 256], strides = [1, 1]} : vector<8x256xf32> to vector<1x256xf32>
    %cst = arith.constant dense<0.000000e+00> : vector<32xf32>
    %12 = vector.multi_reduction <add>, %3, %cst [1] : vector<32x128xf32> to vector<32xf32>
    %13 = vector.shape_cast %12 : vector<32xf32> to vector<32x1xf32>
    %cst_5 = arith.constant 1.280000e+02 : f32
    %14 = vector.broadcast %cst_5 : f32 to vector<32x1xf32>
    %15 = arith.divf %13, %14 : vector<32x1xf32>
    %16 = vector.broadcast %15 : vector<32x1xf32> to vector<32x128xf32>
    %17 = arith.subf %3, %16 : vector<32x128xf32>
    %18 = arith.mulf %17, %17 : vector<32x128xf32>
    %cst_6 = arith.constant dense<0.000000e+00> : vector<32xf32>
    %19 = vector.multi_reduction <add>, %18, %cst_6 [1] : vector<32x128xf32> to vector<32xf32>
    %20 = vector.shape_cast %19 : vector<32xf32> to vector<32x1xf32>
    %cst_7 = arith.constant 1.280000e+02 : f32
    %21 = vector.broadcast %cst_7 : f32 to vector<32x1xf32>
    %22 = arith.divf %20, %21 : vector<32x1xf32>
    %23 = vector.broadcast %15 : vector<32x1xf32> to vector<32x128xf32>
    %24 = arith.subf %3, %23 : vector<32x128xf32>
    %cst_8 = arith.constant 9.99999974E-6 : f32
    %25 = vector.broadcast %cst_8 : f32 to vector<32x1xf32>
    %26 = arith.addf %22, %25 : vector<32x1xf32>
    %27 = math.rsqrt %26 : vector<32x1xf32>
    %28 = vector.broadcast %27 : vector<32x1xf32> to vector<32x128xf32>
    %29 = arith.mulf %24, %28 : vector<32x128xf32>
    %30 = vector.broadcast %6 : vector<1x128xf32> to vector<32x128xf32>
    %31 = arith.mulf %29, %30 : vector<32x128xf32>
    %32 = vector.broadcast %7 : vector<1x128xf32> to vector<32x128xf32>
    %33 = arith.addf %31, %32 : vector<32x128xf32>
    %34 = arith.truncf %33 : vector<32x128xf32> to vector<32x128xbf16>
    %c0_9 = arith.constant 0 : index
    %c0_10 = arith.constant 0 : index
    %c0_11 = arith.constant 0 : index
    %35 = vector.load %arg6[%c0_9, %c0_10, %c0_11] : memref<1x128x512xbf16, #tpu.memory_space<vmem>>, vector<1x128x512xbf16>
    %36 = vector.shape_cast %35 : vector<1x128x512xbf16> to vector<128x512xbf16>
    %cst_12 = arith.constant dense<0.000000e+00> : vector<32x512xf32>
    %37 = tpu.matmul %34, %36, %cst_12 {dimension_numbers = #tpu.dot_dimension_numbers<[1], [0], [0], [1], [0, 0, 1, 1], [], []>} : vector<32x128xbf16>, vector<128x512xbf16>, vector<32x512xf32> -> vector<32x512xf32>
    %38 = vector.extract_strided_slice %37 {offsets = [0, 0], sizes = [32, 256], strides = [1, 1]} : vector<32x512xf32> to vector<32x256xf32>
    %39 = vector.extract_strided_slice %37 {offsets = [0, 256], sizes = [32, 256], strides = [1, 1]} : vector<32x512xf32> to vector<32x256xf32>
    %c0_13 = arith.constant 0 : index
    %c0_14 = arith.constant 0 : index
    %40 = vector.load %arg5[%c0_13, %c0_14] : memref<32x2xf32, #tpu.memory_space<vmem>>, vector<32x1xf32>
    %c1_i32 = arith.constant 1 : i32
    %41 = tpu.dynamic_rotate %38 by %c1_i32 dim 0 : vector<32x256xf32>, i32 -> vector<32x256xf32>
    %42 = vector.broadcast %40 : vector<32x1xf32> to vector<32x256xf32>
    %43 = arith.mulf %42, %41 : vector<32x256xf32>
    %c0_15 = arith.constant 0 : index
    %c1 = arith.constant 1 : index
    %44 = vector.load %arg5[%c0_15, %c1] : memref<32x2xf32, #tpu.memory_space<vmem>>, vector<32x1xf32>
    %c31_i32 = arith.constant 31 : i32
    %45 = tpu.dynamic_rotate %38 by %c31_i32 dim 0 : vector<32x256xf32>, i32 -> vector<32x256xf32>
    %46 = vector.broadcast %44 : vector<32x1xf32> to vector<32x256xf32>
    %47 = arith.mulf %46, %45 : vector<32x256xf32>
    %48 = vector.broadcast %9 : vector<1x256xf32> to vector<32x256xf32>
    %49 = arith.mulf %48, %43 : vector<32x256xf32>
    %50 = vector.broadcast %10 : vector<1x256xf32> to vector<32x256xf32>
    %51 = arith.mulf %50, %38 : vector<32x256xf32>
    %52 = arith.addf %49, %51 : vector<32x256xf32>
    %53 = vector.broadcast %11 : vector<1x256xf32> to vector<32x256xf32>
    %54 = arith.mulf %53, %47 : vector<32x256xf32>
    %55 = arith.addf %52, %54 : vector<32x256xf32>
    %cst_16 = arith.constant 0.000000e+00 : f32
    %56 = vector.broadcast %cst_16 : f32 to vector<32x256xf32>
    %57 = arith.subf %56, %55 : vector<32x256xf32>
    %58 = math.exp %57 : vector<32x256xf32>
    %cst_17 = arith.constant 1.000000e+00 : f32
    %59 = vector.broadcast %cst_17 : f32 to vector<32x256xf32>
    %60 = arith.addf %59, %58 : vector<32x256xf32>
    %61 = tpu.reciprocal %60 {approx = true} : vector<32x256xf32> -> vector<32x256xf32>
    %62 = arith.mulf %55, %61 : vector<32x256xf32>
    %63 = arith.truncf %62 : vector<32x256xf32> to vector<32x256xbf16>
    %c0_18 = arith.constant 0 : index
    %c0_19 = arith.constant 0 : index
    %c0_20 = arith.constant 0 : index
    %64 = vector.load %arg7[%c0_18, %c0_19, %c0_20] : memref<1x256x256xbf16, #tpu.memory_space<vmem>>, vector<1x256x256xbf16>
    %65 = vector.shape_cast %64 : vector<1x256x256xbf16> to vector<256x256xbf16>
    %cst_21 = arith.constant dense<0.000000e+00> : vector<32x256xf32>
    %66 = tpu.matmul %63, %65, %cst_21 {dimension_numbers = #tpu.dot_dimension_numbers<[1], [0], [0], [1], [0, 0, 1, 1], [], []>} : vector<32x256xbf16>, vector<256x256xbf16>, vector<32x256xf32> -> vector<32x256xf32>
    %67 = vector.broadcast %8 : vector<1x256xf32> to vector<32x256xf32>
    %68 = arith.addf %66, %67 : vector<32x256xf32>
    %69 = math.exp %68 : vector<32x256xf32>
    %cst_22 = arith.constant 2.000000e+00 : f32
    %70 = vector.broadcast %cst_22 : f32 to vector<32x256xf32>
    %71 = arith.addf %70, %69 : vector<32x256xf32>
    %72 = tpu.reciprocal %71 {approx = true} : vector<32x256xf32> -> vector<32x256xf32>
    %cst_23 = arith.constant 1.000000e+00 : f32
    %73 = vector.broadcast %cst_23 : f32 to vector<32x256xf32>
    %74 = arith.subf %73, %72 : vector<32x256xf32>
    %75 = arith.mulf %62, %74 : vector<32x256xf32>
    %cst_24 = arith.constant 0.000000e+00 : f32
    %76 = vector.broadcast %cst_24 : f32 to vector<32x256xf32>
    %77 = arith.subf %76, %39 : vector<32x256xf32>
    %78 = math.exp %77 : vector<32x256xf32>
    %cst_25 = arith.constant 1.000000e+00 : f32
    %79 = vector.broadcast %cst_25 : f32 to vector<32x256xf32>
    %80 = arith.addf %79, %78 : vector<32x256xf32>
    %81 = tpu.reciprocal %80 {approx = true} : vector<32x256xf32> -> vector<32x256xf32>
    %82 = arith.mulf %75, %81 : vector<32x256xf32>
    %83 = arith.truncf %82 : vector<32x256xf32> to vector<32x256xbf16>
    %c0_26 = arith.constant 0 : index
    %c0_27 = arith.constant 0 : index
    %c0_28 = arith.constant 0 : index
    %84 = vector.load %arg8[%c0_26, %c0_27, %c0_28] : memref<1x256x128xbf16, #tpu.memory_space<vmem>>, vector<1x256x128xbf16>
    %85 = vector.shape_cast %84 : vector<1x256x128xbf16> to vector<256x128xbf16>
    %cst_29 = arith.constant dense<0.000000e+00> : vector<32x128xf32>
    %86 = tpu.matmul %83, %85, %cst_29 {dimension_numbers = #tpu.dot_dimension_numbers<[1], [0], [0], [1], [0, 0, 1, 1], [], []>} : vector<32x256xbf16>, vector<256x128xbf16>, vector<32x128xf32> -> vector<32x128xf32>
    %87 = arith.addf %86, %3 : vector<32x128xf32>
    %c0_30 = arith.constant 0 : index
    %c0_31 = arith.constant 0 : index
    %88 = vector.load %arg12[%c0_30, %c0_31] : memref<32x128xf32, #tpu.memory_space<vmem>>, vector<32x128xf32>
    tpu.vector_store %arg12[%c0_30, %c0_31], %87 {strides = array<i32>} : memref<32x128xf32, #tpu.memory_space<vmem>>, vector<32x128xf32>,
    %c1_i32_32 = arith.constant 1 : i32
    %89 = arith.cmpi eq, %arg1, %c1_i32_32 : i32
    %90 = arith.extui %89 : i1 to i32
    %c0_i32_33 = arith.constant 0 : i32
    %91 = arith.cmpi ne, %90, %c0_i32_33 : i32
    scf.if %91 {
      %c0_34 = arith.constant 0 : index
      %c0_35 = arith.constant 0 : index
      %92 = vector.load %arg10[%c0_34, %c0_35] : memref<2x128xf32, #tpu.memory_space<vmem>>, vector<1x128xf32>
      %c1_36 = arith.constant 1 : index
      %c0_37 = arith.constant 0 : index
      %93 = vector.load %arg10[%c1_36, %c0_37] : memref<2x128xf32, #tpu.memory_space<vmem>>, vector<1x128xf32>
      %cst_38 = arith.constant dense<0.000000e+00> : vector<32xf32>
      %94 = vector.multi_reduction <add>, %87, %cst_38 [1] : vector<32x128xf32> to vector<32xf32>
      %95 = vector.shape_cast %94 : vector<32xf32> to vector<32x1xf32>
      %cst_39 = arith.constant 1.280000e+02 : f32
      %96 = vector.broadcast %cst_39 : f32 to vector<32x1xf32>
      %97 = arith.divf %95, %96 : vector<32x1xf32>
      %98 = vector.broadcast %97 : vector<32x1xf32> to vector<32x128xf32>
      %99 = arith.subf %87, %98 : vector<32x128xf32>
      %100 = arith.mulf %99, %99 : vector<32x128xf32>
      %cst_40 = arith.constant dense<0.000000e+00> : vector<32xf32>
      %101 = vector.multi_reduction <add>, %100, %cst_40 [1] : vector<32x128xf32> to vector<32xf32>
      %102 = vector.shape_cast %101 : vector<32xf32> to vector<32x1xf32>
      %cst_41 = arith.constant 1.280000e+02 : f32
      %103 = vector.broadcast %cst_41 : f32 to vector<32x1xf32>
      %104 = arith.divf %102, %103 : vector<32x1xf32>
      %105 = vector.broadcast %97 : vector<32x1xf32> to vector<32x128xf32>
      %106 = arith.subf %87, %105 : vector<32x128xf32>
      %cst_42 = arith.constant 9.99999974E-6 : f32
      %107 = vector.broadcast %cst_42 : f32 to vector<32x1xf32>
      %108 = arith.addf %104, %107 : vector<32x1xf32>
      %109 = math.rsqrt %108 : vector<32x1xf32>
      %110 = vector.broadcast %109 : vector<32x1xf32> to vector<32x128xf32>
      %111 = arith.mulf %106, %110 : vector<32x128xf32>
      %112 = vector.broadcast %92 : vector<1x128xf32> to vector<32x128xf32>
      %113 = arith.mulf %111, %112 : vector<32x128xf32>
      %114 = vector.broadcast %93 : vector<1x128xf32> to vector<32x128xf32>
      %115 = arith.addf %113, %114 : vector<32x128xf32>
      %c0_43 = arith.constant 0 : index
      %c0_44 = arith.constant 0 : index
      %116 = vector.load %arg11[%c0_43, %c0_44] : memref<32x128xf32, #tpu.memory_space<vmem>>, vector<32x128xf32>
      tpu.vector_store %arg11[%c0_43, %c0_44], %115 {strides = array<i32>} : memref<32x128xf32, #tpu.memory_space<vmem>>, vector<32x128xf32>,
    } else {
    }
    return
  }
  func.func @transform_0(%arg0: i32, %arg1: i32) -> (i32, i32) {
    %c0_i32 = arith.constant 0 : i32
    %c0_i32_0 = arith.constant 0 : i32
    return %arg0, %c0_i32 : i32, i32
  }
  func.func @transform_1(%arg0: i32, %arg1: i32) -> (i32, i32) {
    %c0_i32 = arith.constant 0 : i32
    %c0_i32_0 = arith.constant 0 : i32
    %c0_i32_1 = arith.constant 0 : i32
    return %c0_i32, %c0_i32_0 : i32, i32
  }
  func.func @transform_2(%arg0: i32, %arg1: i32) -> (i32, i32) {
    %c0_i32 = arith.constant 0 : i32
    %c0_i32_0 = arith.constant 0 : i32
    %c0_i32_1 = arith.constant 0 : i32
    return %c0_i32, %c0_i32_0 : i32, i32
  }
  func.func @transform_3(%arg0: i32, %arg1: i32) -> (i32, i32) {
    %c0_i32 = arith.constant 0 : i32
    %c0_i32_0 = arith.constant 0 : i32
    %c0_i32_1 = arith.constant 0 : i32
    return %c0_i32, %c0_i32_0 : i32, i32
  }
  func.func @transform_4(%arg0: i32, %arg1: i32) -> (i32, i32, i32) {
    %c0_i32 = arith.constant 0 : i32
    %c0_i32_0 = arith.constant 0 : i32
    %c0_i32_1 = arith.constant 0 : i32
    return %arg1, %c0_i32, %c0_i32_0 : i32, i32, i32
  }
  func.func @transform_5(%arg0: i32, %arg1: i32) -> (i32, i32, i32) {
    %c0_i32 = arith.constant 0 : i32
    %c0_i32_0 = arith.constant 0 : i32
    %c0_i32_1 = arith.constant 0 : i32
    return %arg1, %c0_i32, %c0_i32_0 : i32, i32, i32
  }
  func.func @transform_6(%arg0: i32, %arg1: i32) -> (i32, i32, i32) {
    %c0_i32 = arith.constant 0 : i32
    %c0_i32_0 = arith.constant 0 : i32
    %c0_i32_1 = arith.constant 0 : i32
    return %arg1, %c0_i32, %c0_i32_0 : i32, i32, i32
  }
  func.func @transform_7(%arg0: i32, %arg1: i32) -> (i32, i32, i32) {
    %c0_i32 = arith.constant 0 : i32
    %c0_i32_0 = arith.constant 0 : i32
    %c0_i32_1 = arith.constant 0 : i32
    return %arg1, %c0_i32, %c0_i32_0 : i32, i32, i32
  }
  func.func @transform_8(%arg0: i32, %arg1: i32) -> (i32, i32) {
    %c0_i32 = arith.constant 0 : i32
    %c0_i32_0 = arith.constant 0 : i32
    %c0_i32_1 = arith.constant 0 : i32
    return %c0_i32, %c0_i32_0 : i32, i32
  }
  func.func @transform_9(%arg0: i32, %arg1: i32) -> (i32, i32) {
    %c0_i32 = arith.constant 0 : i32
    %c0_i32_0 = arith.constant 0 : i32
    return %arg0, %c0_i32 : i32, i32
  }
}

</mosaic_0001>

<bundles_post_ra>
// kernel: tpu_custom_call.1
= control target key start
LH: loop header
LB: loop body
LE: loop exit
PB: predicated region body
PF: predicated region fallthrough
CT: control target
= control target key end

     0   :  { %s3706_s0 = inlined_call_operand.hbm [shape: bf16[32,64], index: 0, kind: input, shape index: {}]   ;;  %s3707_s1 = inlined_call_operand.vmem [shape: bf16[64,128], index: 1, kind: input, shape index: {}]   ;;  %s3708_s2 = inlined_call_operand.hbm [shape: f32[32,128], index: 2, kind: input, shape index: {}]   ;;  %s3709_s3 = inlined_call_operand.vmem [shape: f32[32,2], index: 3, kind: input, shape index: {}]   ;;  %s3710_s4 = inlined_call_operand.hbm [shape: bf16[2,128,512], index: 4, kind: input, shape index: {}]   ;;  %s3711_s5 = inlined_call_operand.hbm [shape: bf16[2,256,256], index: 5, kind: input, shape index: {}]   ;;  %s3712_s6 = inlined_call_operand.hbm [shape: bf16[2,256,128], index: 6, kind: input, shape index: {}]   ;;  %s3713_s7 = inlined_call_operand.hbm [shape: f32[2,8,256], index: 7, kind: input, shape index: {}]   ;;  %s3714_s8 = inlined_call_operand.vmem [shape: f32[2,128], index: 8, kind: input, shape index: {}]   ;;  %s3715_s9 = inlined_call_operand.hbm [shape: f32[32,128], index: 9, kind: output, shape index: {}]  }
   0x1   :  { %3722 = sst [smem:[#allocation21_spill]] %s3706_s0 }
   0x2   :  { %3723 = sst [smem:[#allocation22_spill]] %s3708_s2 }
   0x3   :  { %3724 = sst [smem:[#allocation23_spill]] %s3710_s4 }
   0x4   :  { %3725 = sst [smem:[#allocation24_spill]] %s3711_s5 }
   0x5   :  { %3726 = sst [smem:[#allocation25_spill]] %s3714_s8 }
   0x6   :  { %3727 = sst [smem:[#allocation26_spill]] %s3715_s9 }
   0x7   :  { %14 = vsyncpa [#allocation4], 0 }
   0x8   :  { %15 = vsyncpa [#allocation7], 0 }
   0x9   :  { %16 = vsyncpa [#allocation5], 0  ;;  %s3018_s30 = smov 0   ;;  %s3020_s10 = smov 0  }
   0xa   :  { %s3022_s11 = smov 0   ;;  %s3024_s12 = smov 0  }
   0xb   :  { %s3026_s13 = smov 0   ;;  %s3028_s14 = smov 0  }
   0xc LB: > { %3728 = sst [smem:[#allocation17_spill]] %s2940_s11  ;;  %s3047_s15 = sadd.s32 4294967295, %s2952_s14   ;;  %s2952_s14 = sphi %s3028_s14, %s22_s14   ;;  %s2948_s13 = sphi %s3026_s13, %s3754_s13   ;;  %s2944_s12 = sphi %s3024_s12, %s3753_s12   ;;  %s2940_s11 = sphi %s3022_s11, %s3749_s11   ;;  %s2936_s10 = sphi %s3020_s10, %s3752_s10   ;;  %s2932_s30 = sphi %s3018_s30, %s3751_s30  }
   0xd   : > { %3729 = sst [smem:[#allocation18_spill]] %s2952_s14  ;;  %p143_p0 = scmp.ne.s32.totalorder %s2936_s10, %s2932_s30 }
   0xe   : > { %p144_p1 = scmp.eq.s32.totalorder %s3047_s15, 0  ;;  %p1959_p2 = scmp.ge.s32.totalorder %s2952_s14, 1 }
   0xf   : > { %p279_p3 = scmp.lt.s32.totalorder %s2952_s14, 3  ;;  %s3731_s0 = sld [smem:[#allocation21_spill]] }
  0x10   : > { %p3055_p4 = por %p144_p1, %p143_p0  ;;  %s2954_s21 = smov [#allocation3]  }
  0x11   : > { %p3062_p5 = pnand %p1959_p2, %p279_p3  ;;  %s295_s22 = sshll.u32 %s2954_s21, 4  ;;  %s296_s22 = int_to_ptr.vmem [resolvable:$true] %s295_s22 }
  0x12   : > { %s3716_s24 = smov 64   ;;  %s3717_s25 = smov 4  }
  0x13   : > { %p2464_p6 = pneg %p3062_p5  ;;  %s31_s26 = sadd.s32 1, %s2948_s13 }
  0x14   : > { %p32_p8 = scmp.ge.s32.totalorder %s31_s26, 2  ;;  %s130_s27 = sadd.s32 1, %s2940_s11 }
  0x15   : > { %s293_s19 = sshll.u32 %s3731_s0, 4  ;;  %p3070_p7 = pnand %p2464_p6, %p144_p1  ;;  %s294_s19 = int_to_ptr.hbm [resolvable:$true] %s293_s19 }
  0x16   : > { %p137_p9 = scmp.ne.s32.totalorder %s2940_s11, %s2936_s10  ;;  %p138_p10 = scmp.eq.s32.totalorder %s2952_s14, 0 }
  0x17   : > { %2467 = dma.hbm_to_vmem [thread:$0]  (!%p3070_p7), %s294_s19, 256, %s296_s22, [#allocation4], %s3716_s24, %s3716_s24, %s3717_s25  }
  0x18   : > { %s3756_s26 = smov (%p32_p8, %s31_s26), 0  ;;  %p3086_p11 = por %p138_p10, %p137_p9 }
  0x19   : > { %3734 = sst [smem:[#allocation19_spill]] %s3756_s26  ;;  %p2486_p12 = scmp.lt.s32.totalorder %s2952_s14, 2 }
  0x1a   : > { %s127_s29 = ssub.s32 %s2948_s13, %s3756_s26  ;;  %s332_s30 = sand.u32 1, %s2952_s14  }
  0x1b   : > { %p128_p13 = scmp.eq.s32.totalorder %s127_s29, 0  ;;  %s3095_s17 = sand.u32 1, %s2940_s11  }
  0x1c   : > { %s2334_s18 = sshll.u32 %s2948_s13, 8  ;;  %s1963_s21 = sshll.u32 %s3095_s17, 8 }
  0x1d   : > { %s3099_s19 = scalar_select %p128_p13, %s2940_s11, %s130_s27  }
  0x1e   : > { %s3737_s4 = sld [smem:[#allocation23_spill]]  ;;  %s336_s9 = scalar_lea.vmem [#allocation8], %s1963_s21 }
  0x1f   : > { %3736 = sst [smem:[#allocation20_spill]] %s3099_s19  ;;  %s344_s8 = sshll.u32 %s336_s9, 4  ;;  %s345_s8 = int_to_ptr.vmem [resolvable:$true] %s344_s8 }
  0x20   : > { %p3109_p0 = pnand %p2486_p12, %p3086_p11  ;;  %s3113_s27 = scalar_lea.sflag [#allocation4], %s332_s30 }
  0x21   : > { %s2957_s24 = smov 256   ;;  %s3739_s5 = sld [smem:[#allocation24_spill]] }
  0x22   : > { %s1969_s11 = sshll.u32 %s3095_s17, 7  ;;  %s2959_s30 = smov 128  }
  0x23   : > { %s2960_s14 = smov 8   ;;  %s3740_s2 = sld [smem:[#allocation22_spill]] }
  0x24   : > { %s341_s25 = scalar_lea.hbm %s3737_s4, %s2334_s18  ;;  %s358_s4 = scalar_lea.vmem [#allocation9], %s1963_s21 }
  0x25   : > { %s342_s0 = sshll.u32 %s341_s25, 4  ;;  %s2958_s25 = smov 16   ;;  %s343_s0 = int_to_ptr.hbm [resolvable:$true] %s342_s0 }
  0x26   : > { %2474 = dma.hbm_to_vmem [thread:$0]  (!%p3109_p0), %s343_s0, 4096, %s345_s8, %s3113_s27, %s2957_s24, %s2957_s24, %s2958_s25  }
  0x27   : > { %s363_s28 = scalar_lea.hbm %s3739_s5, %s2334_s18  ;;  %s366_s26 = sshll.u32 %s358_s4, 4  ;;  %s367_s26 = int_to_ptr.vmem [resolvable:$true] %s366_s26 }
  0x28   : > { %s364_s19 = sshll.u32 %s363_s28, 4  ;;  %s2336_s0 = sshll.u32 %s2948_s13, 7  ;;  %s365_s19 = int_to_ptr.hbm [resolvable:$true] %s364_s19 }
  0x29   : > { %2477 = dma.hbm_to_vmem [thread:$0]  (!%p3109_p0), %s365_s19, 4096, %s367_s26, %s3113_s27, %s2959_s30, %s2959_s30, %s2960_s14  }
  0x2a   : > { %s385_s18 = scalar_lea.hbm %s3712_s6, %s2336_s0  ;;  %s380_s21 = scalar_lea.vmem [#allocation10], %s1969_s11 }
  0x2b   : > { %s388_s4 = sshll.u32 %s380_s21, 4  ;;  %s386_s25 = sshll.u32 %s385_s18, 4  ;;  %s389_s4 = int_to_ptr.vmem [resolvable:$true] %s388_s4  ;;  %s387_s25 = int_to_ptr.hbm [resolvable:$true] %s386_s25 }
  0x2c   : > { %s310_s28 = sshll.u32 %s3740_s2, 4  ;;  %s3741_s5 = smov 4   ;;  %s311_s28 = int_to_ptr.hbm [resolvable:$true] %s310_s28 }
  0x2d   : > { %s3742_s26 = smov 64   ;;  %s2961_s19 = smov [#allocation6]  }
  0x2e   : > { %2480 = dma.hbm_to_vmem [thread:$0]  (!%p3109_p0), %s387_s25, 2048, %s389_s4, %s3113_s27, %s3742_s26, %s3742_s26, %s3741_s5  }
  0x2f   : > { %s312_s8 = sshll.u32 %s2961_s19, 4  ;;  %s1972_s0 = sshll.u32 %s3095_s17, 4  ;;  %s313_s8 = int_to_ptr.vmem [resolvable:$true] %s312_s8 }
  0x30   : > { %2470 = dma.hbm_to_vmem [thread:$0]  (!%p3070_p7), %s311_s28, 512, %s313_s8, [#allocation7], %s2959_s30, %s2959_s30, %s2960_s14  }
  0x31   : > { %s2337_s11 = sshll.u32 %s2948_s13, 4  ;;  %s402_s24 = scalar_lea.vmem [#allocation11], %s1972_s0 }
  0x32   : > { %s411_s18 = sshll.u32 %s402_s24, 4  ;;  %s407_s9 = scalar_lea.hbm %s3713_s7, %s2337_s11  ;;  %s412_s18 = int_to_ptr.vmem [resolvable:$true] %s411_s18 }
  0x33   : > { %s409_s2 = sshll.u32 %s407_s9, 4  ;;  %420 = sbr.rel (%p3062_p5) target bundleno = 1308 (0x51c), region = 56  ;;  %s410_s2 = int_to_ptr.hbm [resolvable:$true] %s409_s2 }
  0x34   : > { %2483 = dma.hbm_to_vmem [thread:$0]  (!%p3109_p0), %s410_s2, 256, %s412_s18, %s3113_s27  }
  0x38   : > { %2915 = dma.done.wait (%p144_p1), [#allocation4], 256  }
  0x39   : > { %2917 = vsyncadd (%p144_p1), [#allocation4], 4294967040 }
  0x3a   : > { %2919 = dma.done.wait (%p144_p1), [#allocation7], 512  }
  0x3b   : > { %2921 = vsyncadd (%p144_p1), [#allocation7], 4294966784  ;;  %s432_s5 = sand.u32 1, %s3047_s15   ;;  %s434_s2 = sand.u32 1, %s2936_s10  }
  0x3c   : > { %s1978_s14 = sshll.u32 %s434_s2, 8  ;;  %s433_s20 = scalar_lea.sflag [#allocation4], %s432_s5 }
  0x3d   : > { %s3160_s23 = scalar_lea.vmem [#allocation8], %s1978_s14 }
  0x3e   : > { %2923 = dma.done.wait (%p3055_p4), %s433_s20, 10496  }
  0x3f   : > { %2925 = vsyncadd (%p3055_p4), %s433_s20, 4294956800  ;;  %s1980_s17 = sshll.u32 %s434_s2, 7  ;;  %s1981_s29 = sshll.u32 %s434_s2, 4 }
  0x40   : > { %s3166_s27 = scalar_lea.vmem [#allocation9], %s1978_s14  ;;  %s3168_s30 = scalar_lea.vmem [#allocation10], %s1980_s17 }
  0x41   : > { %s3170_s4 = scalar_lea.vmem [#allocation11], %s1981_s29  ;;  %p1982_p1 = scmp.ne.s32.totalorder %s2944_s12, 0 }
  0x43   : > { %518 = sbr.rel (%p1982_p1) target bundleno = 226 (0xe2), region = 84 }
  0x48   : > { %v2343_v0 = vld [vmem:[%s3707_s1 + $0x18] sm:$0xff]  ;;  %v2342_v1 = vld [vmem:[%s3707_s1 + $0x10] sm:$0xff]  ;;  %v2341_v2 = vld [vmem:[%s3707_s1 + $0x8] sm:$0xff]  ;;  %vm569_vm0 = vcmask 523264  }
  0x49   : > { %580 = vmatpush.bf16.msra.mxu0 %v2343_v0  ;;  %2424 = vmatpush.bf16.msra.mxu1 %v2343_v0  ;;  %v2340_v3 = vld [vmem:[%s3707_s1] sm:$0xff]  ;;  %v2339_v5 = vld [vmem:[#allocation3 + $0x8] sm:$0xff]  ;;  %v531_v6 = vld [vmem:[#allocation6] sm:$0xff] }
  0x4a   : > { %v2338_v4 = vld [vmem:[#allocation3] sm:$0xff]  ;;  %v532_v12 = vld [vmem:[#allocation6 + $0x8] sm:$0xff]  ;;  %v534_v13 = vld [vmem:[#allocation6 + $0x18] sm:$0xff] }
  0x4b   : > { %v533_v7 = vld [vmem:[#allocation6 + $0x10] sm:$0xff] }
  0x4d   : > { %581 = vmatpush.bf16.msra.mxu0 %v2342_v1  ;;  %2425 = vmatpush.bf16.msra.mxu1 %v2342_v1 }
  0x51   : > { %582 = vmatpush.bf16.msra.mxu0 %v2341_v2  ;;  %2426 = vmatpush.bf16.msra.mxu1 %v2341_v2 }
  0x55   : > { %583 = vmatpush.bf16.msra.mxu0 %v2340_v3  ;;  %2427 = vmatpush.bf16.msra.mxu1 %v2340_v3 }
  0x58   : > { %2007 = vmatmul.msk.bf16.vlgmr.msra.gmra.mxu0 %vm569_vm0, %v2338_v4  ;;  %2008 = vmatmul.msk.bf16.vlgmr.msra.gmra.mxu1 %vm569_vm0, %v2339_v5 }
  0xd5   : > { %v585_v8 = vpop.f32.mrf.mxu0  ;;  %v590_v9 = vpop.f32.mrf.mxu1 }
  0xd6   : > { %v586_v10 = vadd.f32 %v585_v8, %v531_v6  ;;  %v591_v11 = vadd.f32 %v590_v9, %v533_v7 }
  0xd8   : > { %595 = vst [vmem:[#allocation2 + $0x10] sm:$0xff] %v586_v10 }
  0xd9   : > { %597 = vst [vmem:[#allocation2 + $0x18] sm:$0xff] %v591_v11 }
  0xdd   : > { %v587_v14 = vpop.f32.mrf.mxu0  ;;  %v592_v15 = vpop.f32.mrf.mxu1 }
  0xde   : > { %v588_v16 = vadd.f32 %v587_v14, %v532_v12  ;;  %v593_v17 = vadd.f32 %v592_v15, %v534_v13 }
  0xe0   : > { %596 = vst [vmem:[#allocation2] sm:$0xff] %v588_v16 }
  0xe1   : > { %598 = vst [vmem:[#allocation2 + $0x8] sm:$0xff] %v593_v17 }
  0xe2 PF: > { %v601_v18 = vld [vmem:[#allocation2 + $0x18] sm:$0xff]  ;;  %v599_v19 = vld [vmem:[#allocation2 + $0x10] sm:$0xff]  ;;  %v2962_v22 = vmov 128.0   ;;  %v2374_v46 = vld [vmem:[%s3160_s23 + $0xec] sm:$0xf0]  ;;  %p2329_p2 = scmp.ne.s32.totalorder %s2944_s12, 1 }
  0xe3   : > { %609 = vadd.xlane.f32.xlu1 %v601_v18  ;;  %605 = vadd.xlane.f32.xlu0 %v599_v19  ;;  %2562 = vrcp.f32 %v2962_v22  ;;  %v2123_v45 = vld [vmem:[%s3160_s23 + $0xe0] sm:$0xf]  ;;  %v2372_v47 = vld [vmem:[%s3160_s23 + $0xe4] sm:$0xf]  ;;  %v2125_v49 = vld [vmem:[%s3160_s23 + $0xf0] sm:$0xf0] }
  0xe4   : > { %v2124_v48 = vor.u32 %v2374_v46, %v2123_v45  ;;  %v2131_v50 = vld [vmem:[%s3160_s23 + $0xe8] sm:$0xf]  ;;  %v2375_v51 = vld [vmem:[%s3160_s23 + $0xf4] sm:$0xf0]  ;;  %v2128_v52 = vor.u32 %v2372_v47, %v2125_v49  ;;  %v2373_v54 = vld [vmem:[%s3160_s23 + $0xec] sm:$0xf] }
  0xe5   : > { %v2132_v53 = vor.u32 %v2375_v51, %v2131_v50  ;;  %v2133_v55 = vld [vmem:[%s3160_s23 + $0xf8] sm:$0xf0]  ;;  %v2107_v57 = vld [vmem:[%s3160_s23 + $0xc0] sm:$0xf]  ;;  %v2370_v58 = vld [vmem:[%s3160_s23 + $0xcc] sm:$0xf0] }
  0xe6   : > { %896 = vmatpush.bf16.msra.mxu0 %v2124_v48  ;;  %v2136_v56 = vor.u32 %v2373_v54, %v2133_v55  ;;  %915 = vmatpush.bf16.msra.mxu1 %v2128_v52  ;;  %v2368_v59 = vld [vmem:[%s3160_s23 + $0xc4] sm:$0xf]  ;;  %v2108_v60 = vor.u32 %v2370_v58, %v2107_v57  ;;  %v2109_v61 = vld [vmem:[%s3160_s23 + $0xd0] sm:$0xf0]  ;;  %v2115_v62 = vld [vmem:[%s3160_s23 + $0xc8] sm:$0xf] }
  0xe7   : > { %v600_v21 = vld [vmem:[#allocation2] sm:$0xff]  ;;  %934 = vmatpush.bf16.msra.mxu2 %v2132_v53  ;;  %v2371_v63 = vld [vmem:[%s3160_s23 + $0xd4] sm:$0xf0]  ;;  %v2112_v0 = vor.u32 %v2368_v59, %v2109_v61  ;;  %v2369_v2 = vld [vmem:[%s3160_s23 + $0xcc] sm:$0xf] }
  0xe8   : > { %v602_v20 = vld [vmem:[#allocation2 + $0x8] sm:$0xff]  ;;  %953 = vmatpush.bf16.msra.mxu3 %v2136_v56  ;;  %v2116_v1 = vor.u32 %v2371_v63, %v2115_v62  ;;  %v2091_v5 = vld [vmem:[%s3160_s23 + $0xa0] sm:$0xf]  ;;  %v2366_v6 = vld [vmem:[%s3160_s23 + $0xac] sm:$0xf0] }
  0xe9   : > { %v2563_v23 = vpop.eup %2562  ;;  %v2117_v3 = vld [vmem:[%s3160_s23 + $0xd8] sm:$0xf0]  ;;  %v2364_v7 = vld [vmem:[%s3160_s23 + $0xa4] sm:$0xf]  ;;  %v2092_v8 = vor.u32 %v2366_v6, %v2091_v5  ;;  %v2093_v9 = vld [vmem:[%s3160_s23 + $0xb0] sm:$0xf0] }
  0xea   : > { %v614_v24 = vmul.f32 128.0, %v2563_v23  ;;  %vm618_vm1 = vweird.f32 %v2563_v23  ;;  %897 = vmatpush.bf16.msra.mxu0 %v2108_v60  ;;  %v2120_v4 = vor.u32 %v2369_v2, %v2117_v3  ;;  %916 = vmatpush.bf16.msra.mxu1 %v2112_v0  ;;  %v2099_v10 = vld [vmem:[%s3160_s23 + $0xa8] sm:$0xf]  ;;  %v2367_v11 = vld [vmem:[%s3160_s23 + $0xb4] sm:$0xf0]  ;;  %v2096_v12 = vor.u32 %v2364_v7, %v2093_v9 }
  0xeb   : > { %611 = vadd.xlane.f32.xlu1 %v602_v20  ;;  %607 = vadd.xlane.f32.xlu0 %v600_v21  ;;  %v2100_v13 = vor.u32 %v2367_v11, %v2099_v10  ;;  %v2365_v14 = vld [vmem:[%s3160_s23 + $0xac] sm:$0xf]  ;;  %v2101_v15 = vld [vmem:[%s3160_s23 + $0xb8] sm:$0xf0]  ;;  %v2075_v17 = vld [vmem:[%s3160_s23 + $0x80] sm:$0xf] }
  0xec   : > { %v615_v25 = vsub.f32 1.0, %v614_v24  ;;  %935 = vmatpush.bf16.msra.mxu2 %v2116_v1  ;;  %954 = vmatpush.bf16.msra.mxu3 %v2120_v4  ;;  %v2104_v16 = vor.u32 %v2365_v14, %v2101_v15  ;;  %v2083_v22 = vld [vmem:[%s3160_s23 + $0x88] sm:$0xf]  ;;  %v2043_v46 = vld [vmem:[%s3160_s23 + $0x40] sm:$0xf] }
  0xed   : > { %v2354_v47 = vld [vmem:[%s3160_s23 + $0x4c] sm:$0xf0]  ;;  %v2352_v48 = vld [vmem:[%s3160_s23 + $0x44] sm:$0xf]  ;;  %v2045_v50 = vld [vmem:[%s3160_s23 + $0x50] sm:$0xf0] }
  0xee   : > { %v616_v26 = vmul.f32 %v2563_v23, %v615_v25  ;;  %898 = vmatpush.bf16.msra.mxu0 %v2092_v8  ;;  %917 = vmatpush.bf16.msra.mxu1 %v2096_v12  ;;  %v2044_v49 = vor.u32 %v2354_v47, %v2043_v46  ;;  %v2051_v51 = vld [vmem:[%s3160_s23 + $0x48] sm:$0xf]  ;;  %v2355_v52 = vld [vmem:[%s3160_s23 + $0x54] sm:$0xf0]  ;;  %v2048_v53 = vor.u32 %v2352_v48, %v2045_v50  ;;  %v2353_v55 = vld [vmem:[%s3160_s23 + $0x4c] sm:$0xf] }
  0xef   : > { %v2052_v54 = vor.u32 %v2355_v52, %v2051_v51  ;;  %v2053_v56 = vld [vmem:[%s3160_s23 + $0x58] sm:$0xf0]  ;;  %v2027_v58 = vld [vmem:[%s3160_s23 + $0x20] sm:$0xf]  ;;  %v2350_v59 = vld [vmem:[%s3160_s23 + $0x2c] sm:$0xf0] }
  0xf0   : > { %v617_v27 = vadd.f32 %v2563_v23, %v616_v26  ;;  %936 = vmatpush.bf16.msra.mxu2 %v2100_v13  ;;  %955 = vmatpush.bf16.msra.mxu3 %v2104_v16  ;;  %v2361_v26 = vld [vmem:[%s3160_s23 + $0x8c] sm:$0xf]  ;;  %v2056_v57 = vor.u32 %v2353_v55, %v2053_v56  ;;  %v2348_v60 = vld [vmem:[%s3160_s23 + $0x24] sm:$0xf]  ;;  %v2028_v61 = vor.u32 %v2350_v59, %v2027_v58  ;;  %v2029_v62 = vld [vmem:[%s3160_s23 + $0x30] sm:$0xf0] }
  0xf1   : > { %v2035_v63 = vld [vmem:[%s3160_s23 + $0x28] sm:$0xf]  ;;  %v2351_v0 = vld [vmem:[%s3160_s23 + $0x34] sm:$0xf0]  ;;  %v2032_v3 = vor.u32 %v2348_v60, %v2029_v62  ;;  %v2349_v5 = vld [vmem:[%s3160_s23 + $0x2c] sm:$0xf] }
  0xf2   : > { %v3185_v28 = vsel %vm618_vm1, %v2563_v23, %v617_v27  ;;  %v2363_v23 = vld [vmem:[%s3160_s23 + $0x94] sm:$0xf0]  ;;  %v2085_v27 = vld [vmem:[%s3160_s23 + $0x98] sm:$0xf0]  ;;  %v2036_v4 = vor.u32 %v2351_v0, %v2035_v63  ;;  %v2011_v7 = vld [vmem:[%s3160_s23] sm:$0xf] }
  0xf3   : > { %v2084_v25 = vor.u32 %v2363_v23, %v2083_v22  ;;  %v2037_v6 = vld [vmem:[%s3160_s23 + $0x38] sm:$0xf0]  ;;  %v2346_v10 = vld [vmem:[%s3160_s23 + $0xc] sm:$0xf0]  ;;  %v2344_v11 = vld [vmem:[%s3160_s23 + $0x4] sm:$0xf] }
  0xf4   : > { %v2040_v9 = vor.u32 %v2349_v5, %v2037_v6  ;;  %v2013_v12 = vld [vmem:[%s3160_s23 + $0x10] sm:$0xf0]  ;;  %v2012_v13 = vor.u32 %v2346_v10, %v2011_v7  ;;  %v2019_v15 = vld [vmem:[%s3160_s23 + $0x8] sm:$0xf]  ;;  %v2347_v16 = vld [vmem:[%s3160_s23 + $0x14] sm:$0xf0] }
  0xf5   : > { %937 = vmatpush.bf16.msra.mxu2 %v2084_v25  ;;  %v2016_v14 = vor.u32 %v2344_v11, %v2013_v12  ;;  %v973_v55 = vld [vmem:[%s3709_s3 + $0x8] sm:$0xff]  ;;  %v2963_v56 = vmov 1  }
  0xf6   : > { %2555 = vset.pattern.permute.xlu1 %v2963_v56 }
 0x156   : > { %v610_v29 = vpop.xlane.xlu1 %609  ;;  %v606_v30 = vpop.xlane.xlu0 %605 }
 0x157   : > { %v622_v31 = vmul.f32 %v3185_v28, %v610_v29  ;;  %v620_v32 = vmul.f32 %v3185_v28, %v606_v30  ;;  %v2088_v29 = vor.u32 %v2361_v26, %v2085_v27  ;;  %v2059_v30 = vld [vmem:[%s3160_s23 + $0x60] sm:$0xf] }
 0x159   : > { %v3189_v33 = vsub.f32 %v601_v18, %v622_v31  ;;  %v3191_v34 = vsub.f32 %v599_v19, %v620_v32  ;;  %v2362_v18 = vld [vmem:[%s3160_s23 + $0x8c] sm:$0xf0]  ;;  %v2360_v19 = vld [vmem:[%s3160_s23 + $0x84] sm:$0xf]  ;;  %956 = vmatpush.bf16.msra.mxu3 %v2088_v29 }
 0x15a   : > { %v2358_v31 = vld [vmem:[%s3160_s23 + $0x6c] sm:$0xf0]  ;;  %v2356_v32 = vld [vmem:[%s3160_s23 + $0x64] sm:$0xf] }
 0x15b   : > { %v630_v35 = vmul.f32 %v3189_v33, %v3189_v33  ;;  %v628_v36 = vmul.f32 %v3191_v34, %v3191_v34 }
 0x15d   : > { %636 = vadd.xlane.f32.xlu0 %v630_v35  ;;  %632 = vadd.xlane.f32.xlu2 %v628_v36  ;;  %v2060_v35 = vor.u32 %v2358_v31, %v2059_v30  ;;  %v2061_v36 = vld [vmem:[%s3160_s23 + $0x70] sm:$0xf0] }
 0x15e   : > { %v612_v37 = vpop.xlane.xlu1 %611  ;;  %v608_v38 = vpop.xlane.xlu0 %607 }
 0x15f   : > { %v623_v39 = vmul.f32 %v3185_v28, %v612_v37  ;;  %v621_v40 = vmul.f32 %v3185_v28, %v608_v38  ;;  %v2067_v37 = vld [vmem:[%s3160_s23 + $0x68] sm:$0xf]  ;;  %v2359_v38 = vld [vmem:[%s3160_s23 + $0x74] sm:$0xf0] }
 0x161   : > { %v3199_v41 = vsub.f32 %v602_v20, %v623_v39  ;;  %v3201_v42 = vsub.f32 %v600_v21, %v621_v40  ;;  %v2076_v20 = vor.u32 %v2362_v18, %v2075_v17  ;;  %v2077_v21 = vld [vmem:[%s3160_s23 + $0x90] sm:$0xf0]  ;;  %v2064_v39 = vor.u32 %v2356_v32, %v2061_v36  ;;  %v2345_v17 = vld [vmem:[%s3160_s23 + $0xc] sm:$0xf] }
 0x162   : > { %v2080_v24 = vor.u32 %v2360_v19, %v2077_v21  ;;  %v2068_v40 = vor.u32 %v2359_v38, %v2067_v37  ;;  %v2021_v21 = vld [vmem:[%s3160_s23 + $0x18] sm:$0xf0] }
 0x163   : > { %v631_v43 = vmul.f32 %v3199_v41, %v3199_v41  ;;  %v629_v44 = vmul.f32 %v3201_v42, %v3201_v42  ;;  %899 = vmatpush.bf16.msra.mxu0 %v2076_v20  ;;  %v2020_v20 = vor.u32 %v2347_v16, %v2019_v15  ;;  %v2024_v22 = vor.u32 %v2345_v17, %v2021_v21  ;;  %v974_v15 = vld [vmem:[%s3709_s3 + $0x10] sm:$0xff]  ;;  %v2390_v21 = vld [vmem:[%s3166_s27 + $0x74] sm:$0xf] }
 0x164   : > { %918 = vmatpush.bf16.msra.mxu1 %v2080_v24  ;;  %938 = vmatpush.bf16.msra.mxu2 %v2068_v40 }
 0x165   : > { %638 = vadd.xlane.f32.xlu1 %v631_v43  ;;  %634 = vadd.xlane.f32.xlu2 %v629_v44  ;;  %v2357_v43 = vld [vmem:[%s3160_s23 + $0x6c] sm:$0xf]  ;;  %v2069_v44 = vld [vmem:[%s3160_s23 + $0x78] sm:$0xf0]  ;;  %s3745_s23 = sld [smem:[#allocation25_spill]] (!%p2329_p2) }
 0x166   : > { %v2072_v45 = vor.u32 %v2357_v43, %v2069_v44 }
 0x167   : > { %900 = vmatpush.bf16.msra.mxu0 %v2060_v35 }
 0x168   : > { %919 = vmatpush.bf16.msra.mxu1 %v2064_v39  ;;  %957 = vmatpush.bf16.msra.mxu3 %v2072_v45 }
 0x169   : > { %939 = vmatpush.bf16.msra.mxu2 %v2052_v54  ;;  %v972_v54 = vld [vmem:[%s3709_s3] sm:$0xff] }
 0x16b   : > { %901 = vmatpush.bf16.msra.mxu0 %v2044_v49  ;;  %v2404_v49 = vld [vmem:[%s3166_s27 + $0xe4] sm:$0xf] }
 0x16c   : > { %920 = vmatpush.bf16.msra.mxu1 %v2048_v53  ;;  %958 = vmatpush.bf16.msra.mxu3 %v2056_v57  ;;  %v3294_v53 = vld [vmem:[%s3170_s4] sm:$0xff]  ;;  %v2964_v57 = vmov 0  }
 0x16d   : > { %940 = vmatpush.bf16.msra.mxu2 %v2036_v4  ;;  %2554 = vset.pattern.permute.xlu0 %v2964_v57  ;;  %v697_v4 = vperm.slane %v3294_v53, 1 }
 0x16e   : > { %2553 = vset.pattern.permute.xlu2 %v2964_v57 }
 0x16f   : > { %902 = vmatpush.bf16.msra.mxu0 %v2028_v61  ;;  %v692_v61 = vperm.slane %v3294_v53, 0 }
 0x170   : > { %921 = vmatpush.bf16.msra.mxu1 %v2032_v3  ;;  %959 = vmatpush.bf16.msra.mxu3 %v2040_v9 }
 0x171   : > { %941 = vmatpush.bf16.msra.mxu2 %v2020_v20  ;;  %1002 = vperm.xlu0 %2554, %v973_v55  }
 0x173   : > { %903 = vmatpush.bf16.msra.mxu0 %v2012_v13 }
 0x174   : > { %922 = vmatpush.bf16.msra.mxu1 %v2016_v14  ;;  %960 = vmatpush.bf16.msra.mxu3 %v2024_v22  ;;  %v2197_v22 = vld [vmem:[%s3166_s27 + $0x78] sm:$0xf0] }
 0x179   : > { %2561 = vset.pattern.permute.xlu0 %v2963_v56 }
 0x17d   : > { %997 = vperm.xlu2 %2553, %v972_v54  }
 0x17e   : > { %1041 = vperm.xlu1 %2555, %v972_v54   ;;  %v2181_v54 = vld [vmem:[%s3166_s27 + $0x58] sm:$0xf0] }
 0x185   : > { %2556 = vset.pattern.permute.xlu2 %v2963_v56 }
 0x186   : > { %2558 = vset.pattern.permute.xlu1 %v2964_v57  ;;  %1045 = vperm.xlu2 %2556, %v973_v55  }
 0x18e   : > { %2557 = vset.pattern.permute.xlu2 %v2964_v57  ;;  %v2179_v57 = vld [vmem:[%s3166_s27 + $0x50] sm:$0xf] }
 0x18f   : > { %1007 = vperm.xlu2 %2557, %v974_v15  }
 0x197   : > { %2559 = vset.pattern.permute.xlu2 %v2963_v56 }
 0x198   : > { %1049 = vperm.xlu2 %2559, %v974_v15  }
 0x1d0   : > { %v633_v1 = vpop.xlane.xlu2 %632  ;;  %v637_v2 = vpop.xlane.xlu0 %636 }
 0x1d1   : > { %v640_v8 = vmul.f32 %v633_v1, %v3185_v28  ;;  %v642_v19 = vmul.f32 %v637_v2, %v3185_v28 }
 0x1d3   : > { %v644_v18 = vadd.f32 1e-05, %v640_v8  ;;  %v3273_v23 = vadd.f32 1e-05, %v642_v19 }
 0x1d5   : > { %2564 = vrsqrt.f32 %v644_v18  ;;  %vm654_vm3 = vweird.f32 %v644_v18  ;;  %vm674_vm10 = vweird.f32 %v3273_v23 }
 0x1d6   : > { %2566 = vrsqrt.f32 %v3273_v23 }
 0x1d8   : > { %v639_v24 = vpop.xlane.xlu1 %638  ;;  %v635_v25 = vpop.xlane.xlu2 %634 }
 0x1d9   : > { %v643_v26 = vmul.f32 %v639_v24, %v3185_v28  ;;  %v641_v27 = vmul.f32 %v635_v25, %v3185_v28  ;;  %v2200_v24 = vor.u32 %v2390_v21, %v2197_v22  ;;  %v2391_v25 = vld [vmem:[%s3166_s27 + $0x74] sm:$0xf0] }
 0x1db   : > { %v2565_v29 = vpop.eup %2564  ;;  %v647_v30 = vadd.f32 1e-05, %v643_v26  ;;  %v645_v31 = vadd.f32 1e-05, %v641_v27  ;;  %v2259_v26 = vld [vmem:[%s3166_s27 + $0xf0] sm:$0xf]  ;;  %1394 = vmatpush.bf16.msrb.mxu2 %v2200_v24 }
 0x1dc   : > { %v649_v32 = vmul.f32 %v2565_v29, %v644_v18  ;;  %v3278_v37 = vpop.eup %2566  ;;  %vm655_vm2 = vweird.f32 %v2565_v29  ;;  %v2407_v27 = vld [vmem:[%s3166_s27 + $0xf4] sm:$0xf0] }
 0x1dd   : > { %2568 = vrsqrt.f32 %v647_v30  ;;  %v669_v43 = vmul.f32 %v3278_v37, %v3273_v23  ;;  %vm3286_vm4 = vmor %vm654_vm3, %vm655_vm2  ;;  %vm664_vm6 = vweird.f32 %v645_v31  ;;  %vm684_vm8 = vweird.f32 %v647_v30  ;;  %v2195_v23 = vld [vmem:[%s3166_s27 + $0x70] sm:$0xf] }
 0x1de   : > { %v650_v35 = vmul.f32 %v2565_v29, %v649_v32  ;;  %2570 = vrsqrt.f32 %v645_v31  ;;  %vm675_vm11 = vweird.f32 %v3278_v37  ;;  %v2261_v32 = vld [vmem:[%s3166_s27 + $0xf8] sm:$0xf0] }
 0x1df   : > { %v670_v50 = vmul.f32 %v3278_v37, %v669_v43  ;;  %vm676_vm13 = vmor %vm674_vm10, %vm675_vm11 }
 0x1e0   : > { %v651_v36 = vmul.f32 0.5, %v650_v35  ;;  %v3340_v43 = vpop.permute.xlu2 %997 }
 0x1e1   : > { %v671_v62 = vmul.f32 0.5, %v670_v50 }
 0x1e2   : > { %v652_v38 = vsub.f32 1.5, %v651_v36  ;;  %v984_v36 = vlaneseq }
 0x1e3   : > { %v3280_v39 = vpop.eup %2568  ;;  %v672_v5 = vsub.f32 1.5, %v671_v62 }
 0x1e4   : > { %v2571_v40 = vpop.eup %2570  ;;  %v679_v44 = vmul.f32 %v3280_v39, %v647_v30  ;;  %v653_v45 = vmul.f32 %v2565_v29, %v652_v38  ;;  %vm685_vm9 = vweird.f32 %v3280_v39  ;;  %v2260_v30 = vor.u32 %v2407_v27, %v2259_v26 }
 0x1e5   : > { %v659_v46 = vmul.f32 %v2571_v40, %v645_v31  ;;  %vm665_vm5 = vweird.f32 %v2571_v40  ;;  %vm686_vm12 = vmor %vm684_vm8, %vm685_vm9  ;;  %v673_v9 = vmul.f32 %v3278_v37, %v672_v5  ;;  %v2406_v31 = vld [vmem:[%s3166_s27 + $0xf4] sm:$0xf] }
 0x1e6   : > { %v680_v47 = vmul.f32 %v3280_v39, %v679_v44  ;;  %v657_v51 = vsel %vm3286_vm4, %v2565_v29, %v653_v45  ;;  %vm666_vm7 = vmor %vm664_vm6, %vm665_vm5  ;;  %v2196_v29 = vor.u32 %v2391_v25, %v2195_v23  ;;  %v2264_v35 = vor.u32 %v2406_v31, %v2261_v32  ;;  %1375 = vmatpush.bf16.msrb.mxu1 %v2260_v30  ;;  %v2189_v44 = vld [vmem:[%s3166_s27 + $0x68] sm:$0xf0]  ;;  %v2187_v45 = vld [vmem:[%s3166_s27 + $0x60] sm:$0xf] }
 0x1e7   : > { %v660_v48 = vmul.f32 %v2571_v40, %v659_v46  ;;  %v688_v60 = vmul.f32 %v657_v51, %v3191_v34  ;;  %v975_v34 = vld [vmem:[%s3709_s3 + $0x18] sm:$0xff]  ;;  %v677_v12 = vsel %vm676_vm13, %v3278_v37, %v673_v9  ;;  %v2402_v5 = vld [vmem:[%s3166_s27 + $0xd4] sm:$0xf] }
 0x1e8   : > { %v681_v58 = vmul.f32 0.5, %v680_v47  ;;  %1012 = vperm.xlu1 %2558, %v975_v34   ;;  %v690_v14 = vmul.f32 %v677_v12, %v3189_v33  ;;  %1356 = vmatpush.bf16.msrb.mxu0 %v2196_v29  ;;  %v2389_v46 = vld [vmem:[%s3166_s27 + $0x64] sm:$0xf0]  ;;  %v2251_v47 = vld [vmem:[%s3166_s27 + $0xe0] sm:$0xf]  ;;  %v3393_v29 = vperm.slane %v3294_v53, 3 }
 0x1e9   : > { %v661_v52 = vmul.f32 0.5, %v660_v48  ;;  %v693_v3 = vmul.f32 %v692_v61, %v688_v60  ;;  %1413 = vmatpush.bf16.msrb.mxu3 %v2264_v35  ;;  %v2405_v48 = vld [vmem:[%s3166_s27 + $0xe4] sm:$0xf0]  ;;  %v2253_v51 = vld [vmem:[%s3166_s27 + $0xe8] sm:$0xf0]  ;;  %v2188_v55 = vor.u32 %v2389_v46, %v2187_v45 }
 0x1ea   : > { %v682_v0 = vsub.f32 1.5, %v681_v58  ;;  %v695_v17 = vmul.f32 %v692_v61, %v690_v14  ;;  %v2387_v58 = vld [vmem:[%s3166_s27 + $0x54] sm:$0xf0]  ;;  %v2235_v12 = vld [vmem:[%s3166_s27 + $0xc0] sm:$0xf] }
 0x1eb   : > { %v662_v59 = vsub.f32 1.5, %v661_v52  ;;  %v2386_v52 = vld [vmem:[%s3166_s27 + $0x54] sm:$0xf]  ;;  %v3383_v23 = vld [vmem:[%s3170_s4 + $0x8] sm:$0xff] }
 0x1ec   : > { %v683_v7 = vmul.f32 %v3280_v39, %v682_v0  ;;  %v700_v19 = vadd.f32 %v697_v4, %v695_v17  ;;  %v2184_v60 = vor.u32 %v2386_v52, %v2181_v54  ;;  %1357 = vmatpush.bf16.msrb.mxu0 %v2188_v55 }
 0x1ed   : > { %v663_v63 = vmul.f32 %v2571_v40, %v662_v59  ;;  %v2256_v59 = vor.u32 %v2404_v49, %v2253_v51  ;;  %v3416_v51 = vperm.slane %v3383_v23, 5 }
 0x1ee   : > { %v687_v11 = vsel %vm686_vm12, %v3280_v39, %v683_v7  ;;  %v3337_v39 = vshrl.u32 %v984_v36, 7  ;;  %v2173_v7 = vld [vmem:[%s3166_s27 + $0x48] sm:$0xf0]  ;;  %v1074_v36 = vperm.slane %v3294_v53, 4 }
 0x1ef   : > { %v667_v1 = vsel %vm666_vm7, %v2571_v40, %v663_v63  ;;  %v691_v13 = vmul.f32 %v687_v11, %v3199_v41  ;;  %v2388_v40 = vld [vmem:[%s3166_s27 + $0x64] sm:$0xf]  ;;  %v2180_v63 = vor.u32 %v2387_v58, %v2179_v57  ;;  %1414 = vmatpush.bf16.msrb.mxu3 %v2256_v59  ;;  %v3371_v11 = vpop.permute.xlu2 %1045 }
 0x1f0   : > { %v689_v2 = vmul.f32 %v667_v1, %v3201_v42  ;;  %v698_v42 = vadd.f32 %v697_v4, %v693_v3  ;;  %2560 = vset.pattern.permute.xlu1 %v2963_v56  ;;  %v2192_v50 = vor.u32 %v2388_v40, %v2189_v44  ;;  %v2252_v56 = vor.u32 %v2405_v48, %v2251_v47  ;;  %v1042_v0 = vpop.permute.xlu1 %1041  ;;  %v2243_v3 = vld [vmem:[%s3166_s27 + $0xd0] sm:$0xf] }
 0x1f1   : > { %1053 = vperm.xlu1 %2560, %v975_v34   ;;  %v696_v16 = vmul.f32 %v692_v61, %v691_v13  ;;  %vm1031_vm14 = vcmp.lt.s32.totalorder %v3337_v39, 7  ;;  %vm986_vm15 = vcmp.lt.s32.totalorder %v3337_v39, 1  ;;  %v2245_v34 = vld [vmem:[%s3166_s27 + $0xd8] sm:$0xf0]  ;;  %1358 = vmatpush.bf16.msrb.mxu0 %v2180_v63  ;;  %v2401_v13 = vld [vmem:[%s3166_s27 + $0xc4] sm:$0xf0] }
 0x1f2   : > { %v694_v6 = vmul.f32 %v692_v61, %v689_v2  ;;  %1395 = vmatpush.bf16.msrb.mxu2 %v2192_v50  ;;  %1376 = vmatpush.bf16.msrb.mxu1 %v2252_v56  ;;  %v2236_v25 = vor.u32 %v2401_v13, %v2235_v12  ;;  %v3405_v40 = vperm.slane %v3383_v23, 4  ;;  %v3408_v44 = vperm.slane %v3294_v53, 5  ;;  %v2377_v39 = vld [vmem:[%s3166_s27 + $0x4] sm:$0xf0] }
 0x1f3   : > { %v701_v18 = vadd.f32 %v697_v4, %v696_v16  ;;  %v1003_v16 = vpop.permute.xlu0 %1002  ;;  %v3412_v48 = vperm.slane %v3383_v23, 3 }
 0x1f4   : > { %v699_v8 = vadd.f32 %v697_v4, %v694_v6  ;;  %v2403_v4 = vld [vmem:[%s3166_s27 + $0xd4] sm:$0xf0]  ;;  %v2384_v6 = vld [vmem:[%s3166_s27 + $0x44] sm:$0xf] }
 0x1f5   : > { %v703_v41 = vpack.c.bf16 %v701_v18, %v700_v19  ;;  %v2244_v17 = vor.u32 %v2403_v4, %v2243_v3  ;;  %v2248_v18 = vor.u32 %v2402_v5, %v2245_v34  ;;  %v2176_v21 = vor.u32 %v2384_v6, %v2173_v7  ;;  %v2400_v7 = vld [vmem:[%s3166_s27 + $0xc4] sm:$0xf] }
 0x1f6   : > { %v702_v10 = vpack.c.bf16 %v699_v8, %v698_v42  ;;  %1396 = vmatpush.bf16.msrb.mxu2 %v2184_v60  ;;  %v2171_v42 = vld [vmem:[%s3166_s27 + $0x40] sm:$0xf]  ;;  %v2385_v8 = vld [vmem:[%s3166_s27 + $0x44] sm:$0xf0] }
 0x1f7   : > { %v2172_v22 = vor.u32 %v2385_v8, %v2171_v42  ;;  %1377 = vmatpush.bf16.msrb.mxu1 %v2244_v17  ;;  %1415 = vmatpush.bf16.msrb.mxu3 %v2248_v18  ;;  %v2382_v17 = vld [vmem:[%s3166_s27 + $0x34] sm:$0xf] }
 0x1f8   : > { %904 = vmatmul.bf16.vlgmr.msra.gmra.mxu0 %v702_v10  ;;  %923 = vmatmul.bf16.vlgmr.msra.gmra.mxu1 %v702_v10 }
 0x1f9   : > { %942 = vmatmul.bf16.vlgmr.msra.gmra.mxu2 %v702_v10  ;;  %961 = vmatmul.bf16.vlgmr.msra.gmra.mxu3 %v702_v10 }
 0x1fa   : > { %1397 = vmatpush.bf16.msrb.mxu2 %v2176_v21  ;;  %1359 = vmatpush.bf16.msrb.mxu0 %v2172_v22 }
 0x1fb   : > { %1378 = vmatpush.bf16.msrb.mxu1 %v2236_v25  ;;  %v2165_v25 = vld [vmem:[%s3166_s27 + $0x38] sm:$0xf0] }
 0x208   : > { %909 = vmatmul.bf16.gmra.mxu0 %v703_v41  ;;  %928 = vmatmul.bf16.gmra.mxu1 %v703_v41 }
 0x209   : > { %947 = vmatmul.bf16.gmra.mxu2 %v703_v41  ;;  %966 = vmatmul.bf16.gmra.mxu3 %v703_v41 }
 0x25a   : > { %v1013_v46 = vpop.permute.xlu1 %1012 }
 0x275   : > { %v3321_v33 = vpop.f32.mrf.mxu0  ;;  %v3323_v20 = vpop.f32.mrf.mxu1 }
 0x276   : > { %v976_v1 = vrot.slane %v3321_v33, 7  ;;  %v1023_v19 = vrot.slane %v3321_v33, 1  ;;  %v977_v41 = vrot.slane %v3323_v20, 7  ;;  %v1024_v24 = vrot.slane %v3323_v20, 1 }
 0x277   : > { %v3424_v59 = vmul.f32 %v1074_v36, %v3321_v33  ;;  %v3428_v60 = vmul.f32 %v3405_v40, %v3323_v20  ;;  %v2157_v33 = vld [vmem:[%s3166_s27 + $0x28] sm:$0xf0]  ;;  %v2378_v20 = vld [vmem:[%s3166_s27 + $0x14] sm:$0xf] }
 0x27d   : > { %v3333_v37 = vpop.f32.mrf.mxu0  ;;  %v3335_v38 = vpop.f32.mrf.mxu1 }
 0x27e   : > { %v978_v2 = vrot.slane %v3333_v37, 7  ;;  %v1025_v9 = vrot.slane %v3333_v37, 1  ;;  %v979_v10 = vrot.slane %v3335_v38, 7  ;;  %v1026_v14 = vrot.slane %v3335_v38, 1 }
 0x27f   : > { %v1078_v63 = vmul.f32 %v1074_v36, %v3333_v37  ;;  %v1079_v4 = vmul.f32 %v3405_v40, %v3335_v38  ;;  %v2237_v37 = vld [vmem:[%s3166_s27 + $0xc8] sm:$0xf0] }
 0x280   : > { %v991_v15 = vsel %vm986_vm15, %v976_v1, %v978_v2  ;;  %v1036_v26 = vsel %vm1031_vm14, %v1023_v19, %v1025_v9  ;;  %v992_v27 = vsel %vm986_vm15, %v977_v41, %v979_v10  ;;  %v1037_v32 = vsel %vm1031_vm14, %v1024_v24, %v1026_v14 }
 0x281   : > { %v1017_v30 = vmul.f32 %v1003_v16, %v991_v15  ;;  %v1056_v47 = vmul.f32 %v1042_v0, %v1036_v26  ;;  %v1018_v49 = vmul.f32 %v1003_v16, %v992_v27  ;;  %v1057_v52 = vmul.f32 %v1042_v0, %v1037_v32  ;;  %v1008_v0 = vpop.permute.xlu2 %1007  ;;  %v2383_v26 = vld [vmem:[%s3166_s27 + $0x34] sm:$0xf0] }
 0x282   : > { %v2240_v22 = vor.u32 %v2400_v7, %v2237_v37  ;;  %v2219_v7 = vld [vmem:[%s3166_s27 + $0xa0] sm:$0xf]  ;;  %v2397_v37 = vld [vmem:[%s3166_s27 + $0xa4] sm:$0xf0] }
 0x283   : > { %v1068_v54 = vmul.f32 %v3393_v29, %v1017_v30  ;;  %v3436_v5 = vmul.f32 %v3408_v44, %v1056_v47  ;;  %v1069_v34 = vmul.f32 %v3412_v48, %v1018_v49  ;;  %v3444_v42 = vmul.f32 %v3416_v51, %v1057_v52  ;;  %v2229_v52 = vld [vmem:[%s3166_s27 + $0xb8] sm:$0xf0] }
 0x284   : > { %1416 = vmatpush.bf16.msrb.mxu3 %v2240_v22  ;;  %v2147_v22 = vld [vmem:[%s3166_s27 + $0x10] sm:$0xf] }
 0x285   : > { %v3353_v61 = vpop.f32.mrf.mxu0  ;;  %v3355_v62 = vpop.f32.mrf.mxu1  ;;  %v3469_v27 = vadd.f32 %v1079_v4, %v1069_v34  ;;  %v2168_v4 = vor.u32 %v2382_v17, %v2165_v25  ;;  %v2379_v25 = vld [vmem:[%s3166_s27 + $0x14] sm:$0xf0] }
 0x286   : > { %v980_v45 = vrot.slane %v3353_v61, 7  ;;  %v1027_v56 = vrot.slane %v3353_v61, 1  ;;  %v981_v57 = vrot.slane %v3355_v62, 7  ;;  %v1028_v58 = vrot.slane %v3355_v62, 1 }
 0x287   : > { %1398 = vmatpush.bf16.msrb.mxu2 %v2168_v4  ;;  %v2203_v4 = vld [vmem:[%s3166_s27 + $0x80] sm:$0xf] }
 0x288   : > { %v989_v3 = vsel %vm986_vm15, %v978_v2, %v980_v45  ;;  %v3446_v2 = vadd.f32 %v1078_v63, %v1068_v54  ;;  %v1034_v12 = vsel %vm1031_vm14, %v1025_v9, %v1027_v56  ;;  %v1035_v13 = vsel %vm1031_vm14, %v1026_v14, %v1028_v58  ;;  %v2163_v14 = vld [vmem:[%s3166_s27 + $0x30] sm:$0xf]  ;;  %v2380_v54 = vld [vmem:[%s3166_s27 + $0x24] sm:$0xf] }
 0x289   : > { %v990_v15 = vsel %vm986_vm15, %v979_v10, %v981_v57  ;;  %v1019_v16 = vmul.f32 %v1008_v0, %v989_v3  ;;  %v1080_v10 = vmul.f32 %v1074_v36, %v3353_v61  ;;  %v3479_v47 = vmul.f32 %v3371_v11, %v1035_v13  ;;  %v2381_v3 = vld [vmem:[%s3166_s27 + $0x24] sm:$0xf0]  ;;  %v2221_v13 = vld [vmem:[%s3166_s27 + $0xa8] sm:$0xf0] }
 0x28a   : > { %v1020_v49 = vmul.f32 %v1008_v0, %v990_v15  ;;  %v2155_v0 = vld [vmem:[%s3166_s27 + $0x20] sm:$0xf]  ;;  %v2164_v34 = vor.u32 %v2383_v26, %v2163_v14  ;;  %v1050_v15 = vpop.permute.xlu2 %1049  ;;  %v2160_v17 = vor.u32 %v2380_v54, %v2157_v33  ;;  %v2148_v54 = vor.u32 %v2379_v25, %v2147_v22 }
 0x28c   : > { %1360 = vmatpush.bf16.msrb.mxu0 %v2164_v34  ;;  %v3516_v14 = vmul.f32 %v3412_v48, %v1020_v49  ;;  %v2213_v49 = vld [vmem:[%s3166_s27 + $0x98] sm:$0xf0]  ;;  %1399 = vmatpush.bf16.msrb.mxu2 %v2160_v17  ;;  %v2393_v34 = vld [vmem:[%s3166_s27 + $0x84] sm:$0xf0]  ;;  %v1081_v17 = vmul.f32 %v3405_v40, %v3355_v62 }
 0x28d   : > { %v3395_v31 = vpop.f32.mrf.mxu0  ;;  %v3401_v35 = vpop.f32.mrf.mxu1 }
 0x28e   : > { %v982_v50 = vrot.slane %v3395_v31, 7  ;;  %v983_v55 = vrot.slane %v3401_v35, 7  ;;  %v1029_v38 = vrot.slane %v3395_v31, 1  ;;  %v1030_v32 = vrot.slane %v3401_v35, 1 }
 0x290   : > { %v987_v6 = vsel %vm986_vm15, %v980_v45, %v982_v50  ;;  %v988_v8 = vsel %vm986_vm15, %v981_v57, %v983_v55  ;;  %v993_v18 = vsel %vm986_vm15, %v982_v50, %v976_v1  ;;  %v994_v9 = vsel %vm986_vm15, %v983_v55, %v977_v41  ;;  %v2227_v1 = vld [vmem:[%s3166_s27 + $0xb0] sm:$0xf]  ;;  %v2399_v45 = vld [vmem:[%s3166_s27 + $0xb4] sm:$0xf0]  ;;  %v1054_v50 = vpop.permute.xlu1 %1053 }
 0x291   : > { %v1021_v21 = vmul.f32 %v1013_v46, %v987_v6  ;;  %v1022_v30 = vmul.f32 %v1013_v46, %v988_v8  ;;  %v3476_v41 = vmul.f32 %v3371_v11, %v1034_v12  ;;  %v1038_v61 = vsel %vm1031_vm14, %v1029_v38, %v1023_v19  ;;  %v2398_v46 = vld [vmem:[%s3166_s27 + $0xb4] sm:$0xf]  ;;  %v2396_v12 = vld [vmem:[%s3166_s27 + $0xa4] sm:$0xf] }
 0x292   : > { %v1070_v55 = vmul.f32 %v3393_v29, %v1019_v16  ;;  %v1015_v57 = vmul.f32 %v3340_v43, %v993_v18  ;;  %v1082_v11 = vmul.f32 %v1074_v36, %v3395_v31  ;;  %v1016_v63 = vmul.f32 %v3340_v43, %v994_v9  ;;  %v2149_v9 = vld [vmem:[%s3166_s27 + $0x18] sm:$0xf0] }
 0x293   : > { %v1072_v19 = vmul.f32 %v3393_v29, %v1021_v21  ;;  %v2228_v6 = vor.u32 %v2399_v45, %v2227_v1  ;;  %v1073_v8 = vmul.f32 %v3412_v48, %v1022_v30  ;;  %v1039_v31 = vsel %vm1031_vm14, %v1030_v32, %v1024_v24  ;;  %v2211_v1 = vld [vmem:[%s3166_s27 + $0x90] sm:$0xf]  ;;  %v2395_v45 = vld [vmem:[%s3166_s27 + $0x94] sm:$0xf0] }
 0x294   : > { %v1062_v36 = vmul.f32 %v1054_v50, %v1038_v61  ;;  %v1032_v43 = vsel %vm1031_vm14, %v1027_v56, %v1029_v38  ;;  %v2232_v16 = vor.u32 %v2398_v46, %v2229_v52  ;;  %v2156_v18 = vor.u32 %v2381_v3, %v2155_v0 }
 0x295   : > { %v1066_v24 = vmul.f32 %v3393_v29, %v1015_v57  ;;  %v1067_v21 = vmul.f32 %v3412_v48, %v1016_v63  ;;  %v1083_v56 = vmul.f32 %v3405_v40, %v3401_v35  ;;  %1379 = vmatpush.bf16.msrb.mxu1 %v2228_v6  ;;  %v2220_v38 = vor.u32 %v2397_v37, %v2219_v7  ;;  %v2394_v48 = vld [vmem:[%s3166_s27 + $0x94] sm:$0xf]  ;;  %v2139_v63 = vld [vmem:[%s3166_s27] sm:$0xf]  ;;  %v2392_v37 = vld [vmem:[%s3166_s27 + $0x84] sm:$0xf] }
 0x296   : > { %v1088_v26 = vadd.f32 %v1080_v10, %v1070_v55  ;;  %v1063_v30 = vmul.f32 %v1054_v50, %v1039_v31  ;;  %1417 = vmatpush.bf16.msrb.mxu3 %v2232_v16  ;;  %v2224_v29 = vor.u32 %v2396_v12, %v2221_v13  ;;  %v1090_v35 = vadd.f32 %v1082_v11, %v1072_v19  ;;  %v2376_v55 = vld [vmem:[%s3166_s27 + $0x4] sm:$0xf]  ;;  %v2141_v11 = vld [vmem:[%s3166_s27 + $0x8] sm:$0xf0] }
 0x297   : > { %v1091_v61 = vadd.f32 %v1083_v56, %v1073_v8  ;;  %v1033_v46 = vsel %vm1031_vm14, %v1028_v58, %v1030_v32  ;;  %v1060_v52 = vmul.f32 %v1050_v15, %v1032_v43  ;;  %v1100_v10 = vmul.f32 %v3408_v44, %v1062_v36  ;;  %1361 = vmatpush.bf16.msrb.mxu0 %v2156_v18  ;;  %v2205_v8 = vld [vmem:[%s3166_s27 + $0x88] sm:$0xf0] }
 0x298   : > { %v2152_v50 = vor.u32 %v2378_v20, %v2149_v9  ;;  %v2212_v57 = vor.u32 %v2395_v45, %v2211_v1  ;;  %v1084_v58 = vadd.f32 %v3424_v59, %v1066_v24  ;;  %v1096_v32 = vmul.f32 %v3408_v44, %v3476_v41 }
 0x299   : > { %1380 = vmatpush.bf16.msrb.mxu1 %v2220_v38  ;;  %v1085_v33 = vadd.f32 %v3428_v60, %v1067_v21  ;;  %v1101_v0 = vmul.f32 %v3416_v51, %v1063_v30  ;;  %v1061_v3 = vmul.f32 %v1050_v15, %v1033_v46  ;;  %v2216_v19 = vor.u32 %v2394_v48, %v2213_v49 }
 0x29a   : > { %1418 = vmatpush.bf16.msrb.mxu3 %v2224_v29  ;;  %v1097_v6 = vmul.f32 %v3416_v51, %v3479_v47  ;;  %v1098_v7 = vmul.f32 %v3408_v44, %v1060_v52  ;;  %v3544_v59 = vadd.f32 %v3436_v5, %v1084_v58  ;;  %v3547_v41 = vadd.f32 %v1096_v32, %v3446_v2 }
 0x29b   : > { %v3550_v60 = vadd.f32 %v3444_v42, %v1085_v33  ;;  %1400 = vmatpush.bf16.msrb.mxu2 %v2152_v50  ;;  %1362 = vmatpush.bf16.msrb.mxu0 %v2148_v54  ;;  %v2144_v31 = vor.u32 %v2376_v55, %v2141_v11  ;;  %v2140_v36 = vor.u32 %v2377_v39, %v2139_v63 }
 0x29c   : > { %v3553_v43 = vadd.f32 %v1097_v6, %v3469_v27  ;;  %v3555_v47 = vadd.f32 %v1100_v10, %v1090_v35  ;;  %v2204_v44 = vor.u32 %v2393_v34, %v2203_v4  ;;  %v1110_v5 = vsub.f32 0.0, %v3544_v59 }
 0x29d   : > { %1381 = vmatpush.bf16.msrb.mxu1 %v2212_v57  ;;  %v1112_v12 = vsub.f32 0.0, %v3547_v41  ;;  %v3559_v2 = vadd.f32 %v1101_v0, %v1091_v61  ;;  %v2208_v42 = vor.u32 %v2392_v37, %v2205_v8  ;;  %v1111_v13 = vsub.f32 0.0, %v3550_v60 }
 0x29e   : > { %1419 = vmatpush.bf16.msrb.mxu3 %v2216_v19  ;;  %v1113_v15 = vsub.f32 0.0, %v3553_v43  ;;  %v3563_v16 = vadd.f32 %v1098_v7, %v1088_v26  ;;  %v1118_v27 = vmul.f32 1.442695, %v1110_v5  ;;  %v1099_v18 = vmul.f32 %v3416_v51, %v1061_v3 }
 0x29f   : > { %1401 = vmatpush.bf16.msrb.mxu2 %v2144_v31  ;;  %1363 = vmatpush.bf16.msrb.mxu0 %v2140_v36  ;;  %v1122_v20 = vmul.f32 1.442695, %v1112_v12  ;;  %v1116_v24 = vsub.f32 0.0, %v3555_v47  ;;  %v1120_v21 = vmul.f32 1.442695, %v1111_v13  ;;  %v1089_v56 = vadd.f32 %v1081_v17, %v3516_v14  ;;  %v2422_v17 = vld [vmem:[%s3168_s30 + $0x70] sm:$0xff] }
 0x2a0   : > { %v1117_v38 = vsub.f32 0.0, %v3559_v2  ;;  %v1124_v9 = vmul.f32 1.442695, %v1113_v15  ;;  %v1114_v22 = vsub.f32 0.0, %v3563_v16  ;;  %2572 = vpow2.f32 %v1118_v27  ;;  %v2414_v15 = vld [vmem:[%s3168_s30 + $0x30] sm:$0xff]  ;;  %v2413_v27 = vld [vmem:[%s3168_s30 + $0x28] sm:$0xff] }
 0x2a1   : > { %1382 = vmatpush.bf16.msrb.mxu1 %v2204_v44  ;;  %v1107_v25 = vadd.f32 %v1099_v18, %v1089_v56  ;;  %2574 = vpow2.f32 %v1122_v20  ;;  %v1130_v62 = vmul.f32 1.442695, %v1116_v24  ;;  %v3603_v44 = vpop.f32.mrf.mxu3  ;;  %v3617_v18 = vperm.slane %v3294_v53, 2  ;;  %v2412_v24 = vld [vmem:[%s3168_s30 + $0x20] sm:$0xff] }
 0x2a2   : > { %1420 = vmatpush.bf16.msrb.mxu3 %v2208_v42  ;;  %2576 = vpow2.f32 %v1120_v21  ;;  %v1132_v40 = vmul.f32 1.442695, %v1117_v38  ;;  %v1126_v51 = vmul.f32 1.442695, %v1114_v22  ;;  %v2421_v38 = vld [vmem:[%s3168_s30 + $0x68] sm:$0xff] }
 0x2a3   : > { %2578 = vpow2.f32 %v1124_v9  ;;  %v1115_v26 = vsub.f32 0.0, %v1107_v25 }
 0x2a4   : > { %2580 = vpow2.f32 %v1130_v62  ;;  %v3628_v62 = vperm.slane %v3383_v23, 2  ;;  %v2419_v23 = vld [vmem:[%s3168_s30 + $0x58] sm:$0xff] }
 0x2a5   : > { %2582 = vpow2.f32 %v1132_v40  ;;  %v1128_v61 = vmul.f32 1.442695, %v1115_v26 }
 0x2a6   : > { %v2573_v30 = vpop.eup %2572  ;;  %2584 = vpow2.f32 %v1126_v51  ;;  %v2420_v51 = vld [vmem:[%s3168_s30 + $0x60] sm:$0xff] }
 0x2a7   : > { %v2575_v29 = vpop.eup %2574  ;;  %v1134_v14 = vadd.f32 1.0, %v2573_v30 }
 0x2a8   : > { %v2577_v1 = vpop.eup %2576  ;;  %v1136_v45 = vadd.f32 1.0, %v2575_v29 }
 0x2a9   : > { %v2579_v35 = vpop.eup %2578  ;;  %2586 = vrcp.f32 %v1134_v14  ;;  %v1135_v46 = vadd.f32 1.0, %v2577_v1  ;;  %v3605_v12 = vpop.f32.mrf.mxu3  ;;  %v2410_v14 = vld [vmem:[%s3168_s30 + $0x10] sm:$0xff] }
 0x2aa   : > { %2588 = vrcp.f32 %v1136_v45  ;;  %v1137_v52 = vadd.f32 1.0, %v2579_v35  ;;  %v2581_v48 = vpop.eup %2580 }
 0x2ab   : > { %2590 = vrcp.f32 %v1135_v46  ;;  %v2583_v49 = vpop.eup %2582  ;;  %v1140_v39 = vadd.f32 1.0, %v2581_v48 }
 0x2ac   : > { %2592 = vrcp.f32 %v1137_v52  ;;  %v2585_v10 = vpop.eup %2584  ;;  %v1141_v33 = vadd.f32 1.0, %v2583_v49 }
 0x2ad   : > { %2594 = vpow2.f32 %v1128_v61  ;;  %v1138_v19 = vadd.f32 1.0, %v2585_v10  ;;  %v2409_v10 = vld [vmem:[%s3168_s30 + $0x8] sm:$0xff] }
 0x2ae   : > { %2596 = vrcp.f32 %v1140_v39  ;;  %v2418_v39 = vld [vmem:[%s3168_s30 + $0x50] sm:$0xff] }
 0x2af   : > { %v2587_v50 = vpop.eup %2586  ;;  %2598 = vrcp.f32 %v1141_v33 }
 0x2b0   : > { %v2589_v54 = vpop.eup %2588  ;;  %v3573_v55 = vmul.f32 %v2587_v50, %v3544_v59  ;;  %2600 = vrcp.f32 %v1138_v19  ;;  %v1481_v50 = vsub.f32 0.0, %v3603_v44 }
 0x2b1   : > { %v2591_v57 = vpop.eup %2590  ;;  %v3576_v11 = vmul.f32 %v2589_v54, %v3547_v41  ;;  %v3610_v13 = vpop.f32.mrf.mxu3 }
 0x2b2   : > { %v2593_v63 = vpop.eup %2592  ;;  %v3579_v58 = vmul.f32 %v2591_v57, %v3550_v60 }
 0x2b3   : > { %v2595_v32 = vpop.eup %2594  ;;  %v1158_v0 = vpack.c.bf16 %v3576_v11, %v3573_v55  ;;  %v3584_v3 = vmul.f32 %v2593_v63, %v3553_v43  ;;  %v1483_v63 = vsub.f32 0.0, %v3605_v12 }
 0x2b4   : > { %v1139_v34 = vadd.f32 1.0, %v2595_v32  ;;  %v2597_v6 = vpop.eup %2596 }
 0x2b5   : > { %1364 = vmatmul.bf16.vlgmr.msrb.gmra.mxu0 %v1158_v0  ;;  %v1159_v4 = vpack.c.bf16 %v3584_v3, %v3579_v58  ;;  %1402 = vmatmul.bf16.vlgmr.msrb.gmra.mxu2 %v1158_v0  ;;  %v2599_v7 = vpop.eup %2598  ;;  %v3589_v8 = vmul.f32 %v2597_v6, %v3555_v47  ;;  %v943_v47 = vpop.f32.mrf.mxu2 }
 0x2b6   : > { %2602 = vrcp.f32 %v1139_v34  ;;  %v2601_v37 = vpop.eup %2600  ;;  %v3595_v60 = vmul.f32 %v2599_v7, %v3559_v2  ;;  %v2415_v2 = vld [vmem:[%s3168_s30 + $0x38] sm:$0xff]  ;;  %v1480_v40 = vsub.f32 0.0, %v943_v47  ;;  %v1490_v34 = vmul.f32 1.442695, %v1481_v50 }
 0x2b7   : > { %1383 = vmatmul.bf16.vlgmr.msrb.gmra.mxu1 %v1159_v4  ;;  %1421 = vmatmul.bf16.vlgmr.msrb.gmra.mxu3 %v1159_v4  ;;  %v3592_v41 = vmul.f32 %v2601_v37, %v3563_v16  ;;  %v2423_v16 = vld [vmem:[%s3168_s30 + $0x78] sm:$0xff]  ;;  %v2408_v4 = vld [vmem:[%s3168_s30] sm:$0xff]  ;;  %v1494_v7 = vmul.f32 1.442695, %v1483_v63 }
 0x2b8   : > { %1660 = vmatpush.bf16.msra.mxu0 %v2415_v2  ;;  %2428 = vmatpush.bf16.msra.mxu2 %v2415_v2  ;;  %v1488_v45 = vmul.f32 1.442695, %v1480_v40 }
 0x2b9   : > { %v1160_v31 = vpack.c.bf16 %v3589_v8, %v3592_v41  ;;  %1679 = vmatpush.bf16.msra.mxu1 %v2423_v16  ;;  %2436 = vmatpush.bf16.msra.mxu3 %v2423_v16  ;;  %v3622_v21 = vpop.f32.mrf.mxu3 }
 0x2bc   : > { %v2603_v59 = vpop.eup %2602  ;;  %1661 = vmatpush.bf16.msra.mxu0 %v2414_v15  ;;  %2429 = vmatpush.bf16.msra.mxu2 %v2414_v15 }
 0x2bd   : > { %v3599_v36 = vmul.f32 %v2603_v59, %v1107_v25  ;;  %v945_v5 = vpop.f32.mrf.mxu2  ;;  %1680 = vmatpush.bf16.msra.mxu1 %v2422_v17  ;;  %2437 = vmatpush.bf16.msra.mxu3 %v2422_v17  ;;  %v2411_v25 = vld [vmem:[%s3168_s30 + $0x18] sm:$0xff] }
 0x2be   : > { %v1482_v30 = vsub.f32 0.0, %v945_v5 }
 0x2bf   : > { %v1161_v43 = vpack.c.bf16 %v3595_v60, %v3599_v36 }
 0x2c0   : > { %1662 = vmatpush.bf16.msra.mxu0 %v2413_v27  ;;  %2430 = vmatpush.bf16.msra.mxu2 %v2413_v27  ;;  %v1492_v48 = vmul.f32 1.442695, %v1482_v30 }
 0x2c1   : > { %1681 = vmatpush.bf16.msra.mxu1 %v2421_v38  ;;  %2438 = vmatpush.bf16.msra.mxu3 %v2421_v38 }
 0x2c4   : > { %1663 = vmatpush.bf16.msra.mxu0 %v2412_v24  ;;  %2431 = vmatpush.bf16.msra.mxu2 %v2412_v24 }
 0x2c5   : > { %1369 = vmatmul.bf16.gmra.mxu0 %v1160_v31  ;;  %1407 = vmatmul.bf16.gmra.mxu2 %v1160_v31  ;;  %v3608_v42 = vpop.f32.mrf.mxu2  ;;  %v2417_v31 = vld [vmem:[%s3168_s30 + $0x48] sm:$0xff] }
 0x2c6   : > { %1682 = vmatpush.bf16.msra.mxu1 %v2420_v51  ;;  %2439 = vmatpush.bf16.msra.mxu3 %v2420_v51  ;;  %v1484_v5 = vsub.f32 0.0, %v3608_v42 }
 0x2c7   : > { %1388 = vmatmul.bf16.gmra.mxu1 %v1161_v43  ;;  %1426 = vmatmul.bf16.gmra.mxu3 %v1161_v43 }
 0x2c8   : > { %1664 = vmatpush.bf16.msra.mxu0 %v2411_v25  ;;  %2432 = vmatpush.bf16.msra.mxu2 %v2411_v25  ;;  %v1496_v25 = vmul.f32 1.442695, %v1484_v5 }
 0x2ca   : > { %1683 = vmatpush.bf16.msra.mxu1 %v2419_v23  ;;  %2440 = vmatpush.bf16.msra.mxu3 %v2419_v23 }
 0x2cc   : > { %1665 = vmatpush.bf16.msra.mxu0 %v2410_v14  ;;  %2433 = vmatpush.bf16.msra.mxu2 %v2410_v14 }
 0x2cd   : > { %v3619_v20 = vpop.f32.mrf.mxu2 }
 0x2ce   : > { %1684 = vmatpush.bf16.msra.mxu1 %v2418_v39  ;;  %2441 = vmatpush.bf16.msra.mxu3 %v2418_v39  ;;  %v1486_v17 = vsub.f32 0.0, %v3619_v20 }
 0x2d0   : > { %1666 = vmatpush.bf16.msra.mxu0 %v2409_v10  ;;  %2434 = vmatpush.bf16.msra.mxu2 %v2409_v10  ;;  %v1500_v30 = vmul.f32 1.442695, %v1486_v17 }
 0x2d2   : > { %1685 = vmatpush.bf16.msra.mxu1 %v2417_v31  ;;  %2442 = vmatpush.bf16.msra.mxu3 %v2417_v31 }
 0x2d4   : > { %1667 = vmatpush.bf16.msra.mxu0 %v2408_v4  ;;  %2435 = vmatpush.bf16.msra.mxu2 %v2408_v4 }
 0x332   : > { %v1365_v56 = vpop.f32.mrf.mxu0 }
 0x333   : > { %v1366_v9 = vadd.f32 %v1365_v56, %v3617_v18  ;;  %v2416_v56 = vld [vmem:[%s3168_s30 + $0x40] sm:$0xff] }
 0x334   : > { %v1384_v22 = vpop.f32.mrf.mxu1  ;;  %1686 = vmatpush.bf16.msra.mxu1 %v2416_v56  ;;  %2443 = vmatpush.bf16.msra.mxu3 %v2416_v56 }
 0x335   : > { %v1385_v53 = vadd.f32 %v1384_v22, %v1366_v9 }
 0x337   : > { %v1432_v26 = vmul.f32 1.442695, %v1385_v53 }
 0x338   : > { %v1403_v29 = vpop.f32.mrf.mxu2 }
 0x339   : > { %2604 = vpow2.f32 %v1432_v26  ;;  %v1404_v1 = vadd.f32 %v1403_v29, %v3628_v62 }
 0x33a   : > { %v1422_v35 = vpop.f32.mrf.mxu3  ;;  %v1367_v61 = vpop.f32.mrf.mxu0  ;;  %2606 = vpow2.f32 %v1488_v45 }
 0x33b   : > { %v1423_v46 = vadd.f32 %v1422_v35, %v1404_v1  ;;  %v1368_v52 = vadd.f32 %v1367_v61, %v3617_v18  ;;  %v1485_v61 = vsub.f32 0.0, %v3610_v13 }
 0x33c   : > { %v1386_v49 = vpop.f32.mrf.mxu1 }
 0x33d   : > { %v1434_v54 = vmul.f32 1.442695, %v1423_v46  ;;  %v1387_v57 = vadd.f32 %v1386_v49, %v1368_v52 }
 0x33f   : > { %v2605_v32 = vpop.eup %2604  ;;  %2608 = vpow2.f32 %v1434_v54  ;;  %v1436_v33 = vmul.f32 1.442695, %v1387_v57  ;;  %v1487_v54 = vsub.f32 0.0, %v3622_v21 }
 0x340   : > { %2610 = vpow2.f32 %v1492_v48  ;;  %v1448_v0 = vadd.f32 2.0, %v2605_v32  ;;  %v1405_v19 = vpop.f32.mrf.mxu2  ;;  %v2607_v44 = vpop.eup %2606 }
 0x341   : > { %2612 = vpow2.f32 %v1436_v33  ;;  %v1406_v6 = vadd.f32 %v1405_v19, %v3628_v62  ;;  %v1504_v9 = vadd.f32 1.0, %v2607_v44  ;;  %v1498_v33 = vmul.f32 1.442695, %v1485_v61 }
 0x342   : > { %v1424_v37 = vpop.f32.mrf.mxu3  ;;  %v1370_v59 = vpop.f32.mrf.mxu0  ;;  %2614 = vrcp.f32 %v1448_v0  ;;  %v1502_v21 = vmul.f32 1.442695, %v1487_v54 }
 0x343   : > { %v1425_v43 = vadd.f32 %v1424_v37, %v1406_v6  ;;  %v1371_v47 = vadd.f32 %v1370_v59, %v3617_v18  ;;  %2616 = vpow2.f32 %v1490_v34 }
 0x344   : > { %v1389_v12 = vpop.f32.mrf.mxu1  ;;  %2618 = vpow2.f32 %v1494_v7 }
 0x345   : > { %v2609_v2 = vpop.eup %2608  ;;  %v1438_v15 = vmul.f32 1.442695, %v1425_v43  ;;  %v1390_v16 = vadd.f32 %v1389_v12, %v1371_v47 }
 0x346   : > { %v2611_v27 = vpop.eup %2610  ;;  %v1449_v24 = vadd.f32 2.0, %v2609_v2 }
 0x347   : > { %v2613_v38 = vpop.eup %2612  ;;  %2620 = vpow2.f32 %v1438_v15  ;;  %v1440_v22 = vmul.f32 1.442695, %v1390_v16  ;;  %v1506_v40 = vadd.f32 1.0, %v2611_v27 }
 0x348   : > { %2622 = vrcp.f32 %v1449_v24  ;;  %v1450_v42 = vadd.f32 2.0, %v2613_v38  ;;  %v1408_v53 = vpop.f32.mrf.mxu2  ;;  %v2615_v26 = vpop.eup %2614 }
 0x349   : > { %2624 = vpow2.f32 %v1440_v22  ;;  %v1409_v51 = vadd.f32 %v1408_v53, %v3628_v62  ;;  %v2617_v14 = vpop.eup %2616  ;;  %v1464_v52 = vsub.f32 1.0, %v2615_v26 }
 0x34a   : > { %2626 = vrcp.f32 %v1450_v42  ;;  %v1427_v20 = vpop.f32.mrf.mxu3  ;;  %v1372_v29 = vpop.f32.mrf.mxu0  ;;  %v1505_v50 = vadd.f32 1.0, %v2617_v14 }
 0x34b   : > { %2628 = vrcp.f32 %v1504_v9  ;;  %v1428_v1 = vadd.f32 %v1427_v20, %v1409_v51  ;;  %v1373_v45 = vadd.f32 %v1372_v29, %v3617_v18  ;;  %v2619_v35 = vpop.eup %2618  ;;  %v1472_v4 = vmul.f32 %v1464_v52, %v3573_v55 }
 0x34c   : > { %2630 = vpow2.f32 %v1496_v25  ;;  %v1391_v23 = vpop.f32.mrf.mxu1  ;;  %v1507_v39 = vadd.f32 1.0, %v2619_v35 }
 0x34d   : > { %v2621_v46 = vpop.eup %2620  ;;  %2632 = vrcp.f32 %v1506_v40  ;;  %v1442_v48 = vmul.f32 1.442695, %v1428_v1  ;;  %v1392_v49 = vadd.f32 %v1391_v23, %v1373_v45 }
 0x34e   : > { %v2623_v10 = vpop.eup %2622  ;;  %2634 = vpow2.f32 %v1500_v30  ;;  %v1451_v57 = vadd.f32 2.0, %v2621_v46 }
 0x34f   : > { %v2625_v63 = vpop.eup %2624  ;;  %2636 = vpow2.f32 %v1442_v48  ;;  %v1444_v18 = vmul.f32 1.442695, %v1392_v49  ;;  %v1465_v31 = vsub.f32 1.0, %v2623_v10 }
 0x350   : > { %v2627_v32 = vpop.eup %2626  ;;  %2638 = vrcp.f32 %v1451_v57  ;;  %v1452_v13 = vadd.f32 2.0, %v2625_v63  ;;  %v1410_v0 = vpop.f32.mrf.mxu2 }
 0x351   : > { %v2629_v19 = vpop.eup %2628  ;;  %v1466_v34 = vsub.f32 1.0, %v2627_v32  ;;  %2640 = vpow2.f32 %v1444_v18  ;;  %v1411_v6 = vadd.f32 %v1410_v0, %v3628_v62  ;;  %v1473_v27 = vmul.f32 %v1465_v31, %v3579_v58 }
 0x352   : > { %v2631_v7 = vpop.eup %2630  ;;  %2642 = vrcp.f32 %v1505_v50  ;;  %v1429_v37 = vpop.f32.mrf.mxu3  ;;  %v1520_v55 = vmul.f32 %v2629_v19, %v1472_v4 }
 0x353   : > { %v2633_v59 = vpop.eup %2632  ;;  %2644 = vrcp.f32 %v1507_v39  ;;  %v1474_v43 = vmul.f32 %v1466_v34, %v3576_v11  ;;  %v1430_v47 = vadd.f32 %v1429_v37, %v1411_v6  ;;  %v1508_v9 = vadd.f32 1.0, %v2631_v7  ;;  %v2669_v7 = vld [vmem:[#allocation2] sm:$0xff] }
 0x354   : > { %v2635_v44 = vpop.eup %2634  ;;  %2646 = vrcp.f32 %v1452_v13 }
 0x355   : > { %v2637_v5 = vpop.eup %2636  ;;  %2648 = vpow2.f32 %v1498_v33  ;;  %v1446_v12 = vmul.f32 1.442695, %v1430_v47  ;;  %v1522_v2 = vmul.f32 %v2633_v59, %v1474_v43  ;;  %v1510_v42 = vadd.f32 1.0, %v2635_v44 }
 0x356   : > { %v2639_v15 = vpop.eup %2638  ;;  %2650 = vpow2.f32 %v1502_v21  ;;  %v1453_v62 = vadd.f32 2.0, %v2637_v5  ;;  %v2671_v5 = vld [vmem:[#allocation2 + $0x8] sm:$0xff] }
 0x357   : > { %v2641_v16 = vpop.eup %2640  ;;  %v1467_v17 = vsub.f32 1.0, %v2639_v15  ;;  %2652 = vpow2.f32 %v1446_v12  ;;  %v1528_v24 = vpack.c.bf16 %v1522_v2, %v1520_v55 }
 0x358   : > { %v2643_v56 = vpop.eup %2642  ;;  %v1454_v38 = vadd.f32 2.0, %v2641_v16  ;;  %2654 = vrcp.f32 %v1453_v62 }
 0x359   : > { %v2645_v11 = vpop.eup %2644  ;;  %v1475_v22 = vmul.f32 %v1467_v17, %v3584_v3  ;;  %1668 = vmatmul.bf16.vlgmr.msra.gmra.mxu0 %v1528_v24  ;;  %v1521_v40 = vmul.f32 %v2643_v56, %v1473_v27 }
 0x35a   : > { %v2647_v25 = vpop.eup %2646  ;;  %2656 = vrcp.f32 %v1454_v38 }
 0x35b   : > { %v2649_v53 = vpop.eup %2648  ;;  %v1523_v51 = vmul.f32 %v2645_v11, %v1475_v22  ;;  %2658 = vrcp.f32 %v1508_v9  ;;  %v1468_v58 = vsub.f32 1.0, %v2647_v25 }
 0x35c   : > { %v2651_v26 = vpop.eup %2650  ;;  %2660 = vrcp.f32 %v1510_v42  ;;  %v1509_v1 = vadd.f32 1.0, %v2649_v53 }
 0x35d   : > { %v2653_v30 = vpop.eup %2652  ;;  %v1529_v20 = vpack.c.bf16 %v1523_v51, %v1521_v40  ;;  %v1511_v3 = vadd.f32 1.0, %v2651_v26  ;;  %v1476_v35 = vmul.f32 %v1468_v58, %v3592_v41 }
 0x35e   : > { %v1455_v29 = vadd.f32 2.0, %v2653_v30  ;;  %v2655_v14 = vpop.eup %2654 }
 0x35f   : > { %1687 = vmatmul.bf16.vlgmr.msra.gmra.mxu1 %v1529_v20  ;;  %v1469_v46 = vsub.f32 1.0, %v2655_v14 }
 0x360   : > { %v2657_v45 = vpop.eup %2656  ;;  %2662 = vrcp.f32 %v1455_v29 }
 0x361   : > { %v1470_v61 = vsub.f32 1.0, %v2657_v45  ;;  %v2659_v23 = vpop.eup %2658  ;;  %2664 = vrcp.f32 %v1509_v1  ;;  %v1477_v54 = vmul.f32 %v1469_v46, %v3599_v36 }
 0x362   : > { %v2661_v48 = vpop.eup %2660  ;;  %2666 = vrcp.f32 %v1511_v3  ;;  %v1524_v49 = vmul.f32 %v2659_v23, %v1476_v35 }
 0x363   : > { %v1478_v52 = vmul.f32 %v1470_v61, %v3589_v8  ;;  %v2668_v8 = vld [vmem:[#allocation2 + $0x10] sm:$0xff] }
 0x365   : > { %v1526_v10 = vmul.f32 %v2661_v48, %v1478_v52 }
 0x366   : > { %v2663_v50 = vpop.eup %2662 }
 0x367   : > { %v1471_v57 = vsub.f32 1.0, %v2663_v50  ;;  %v1530_v63 = vpack.c.bf16 %v1526_v10, %v1524_v49  ;;  %v2665_v39 = vpop.eup %2664 }
 0x368   : > { %v2667_v41 = vpop.eup %2666  ;;  %v1525_v32 = vmul.f32 %v2665_v39, %v1477_v54 }
 0x369   : > { %v1479_v18 = vmul.f32 %v1471_v57, %v3595_v60  ;;  %1673 = vmatmul.bf16.vlgmr.msra.gmra.mxu2 %v1530_v63  ;;  %v2670_v60 = vld [vmem:[#allocation2 + $0x18] sm:$0xff] }
 0x36b   : > { %v1527_v33 = vmul.f32 %v2667_v41, %v1479_v18 }
 0x36d   : > { %v1531_v13 = vpack.c.bf16 %v1527_v33, %v1525_v32 }
 0x36f   : > { %1692 = vmatmul.bf16.vlgmr.msra.gmra.mxu3 %v1531_v13 }
 0x3d6   : > { %v1669_v0 = vpop.f32.mrf.mxu0 }
 0x3d7   : > { %v1670_v19 = vadd.f32 %v2668_v8, %v1669_v0 }
 0x3dc   : > { %v1688_v4 = vpop.f32.mrf.mxu1 }
 0x3dd   : > { %v1689_v34 = vadd.f32 %v1688_v4, %v1670_v19 }
 0x3de   : > { %v1671_v6 = vpop.f32.mrf.mxu0 }
 0x3df   : > { %1698 = vst [vmem:[#allocation2 + $0x10] sm:$0xff] %v1689_v34  ;;  %v1672_v36 = vadd.f32 %v2669_v7, %v1671_v6 }
 0x3e4   : > { %v1690_v21 = vpop.f32.mrf.mxu1 }
 0x3e5   : > { %v1691_v37 = vadd.f32 %v1690_v21, %v1672_v36 }
 0x3e7   : > { %1699 = vst [vmem:[#allocation2] sm:$0xff] %v1691_v37 }
 0x3ec   : > { %v1674_v59 = vpop.f32.mrf.mxu2 }
 0x3ed   : > { %v1675_v31 = vadd.f32 %v2670_v60, %v1674_v59 }
 0x3f2   : > { %v1693_v43 = vpop.f32.mrf.mxu3 }
 0x3f3   : > { %v1694_v47 = vadd.f32 %v1693_v43, %v1675_v31 }
 0x3f4   : > { %v1676_v44 = vpop.f32.mrf.mxu2 }
 0x3f5   : > { %1700 = vst [vmem:[#allocation2 + $0x18] sm:$0xff] %v1694_v47  ;;  %v1677_v12 = vadd.f32 %v2671_v5, %v1676_v44 }
 0x3f9   : > { %1705 = sbr.rel (%p2329_p2) target bundleno = 1298 (0x512), region = 88 }
 0x3fa   : > { %v1695_v55 = vpop.f32.mrf.mxu3 }
 0x3fb   : > { %v1696_v2 = vadd.f32 %v1695_v55, %v1677_v12 }
 0x3fd   : > { %1701 = vst [vmem:[#allocation2 + $0x8] sm:$0xff] %v1696_v2 }
 0x3fe   : > { %1712 = vadd.xlane.f32.xlu1 %v1694_v47  ;;  %1708 = vadd.xlane.f32.xlu0 %v1689_v34  ;;  %v2672_v33 = vld [vmem:[%s3745_s23] ss:$0 sm:$0xff] }
 0x406   : > { %1714 = vadd.xlane.f32.xlu1 %v1696_v2  ;;  %1710 = vadd.xlane.f32.xlu0 %v1691_v37 }
 0x471   : > { %v1713_v15 = vpop.xlane.xlu1 %1712  ;;  %v1709_v62 = vpop.xlane.xlu0 %1708 }
 0x472   : > { %v1718_v16 = vmul.f32 %v1713_v15, %v3185_v28  ;;  %v1716_v27 = vmul.f32 %v1709_v62, %v3185_v28 }
 0x474   : > { %v1722_v17 = vsub.f32 %v1694_v47, %v1718_v16  ;;  %v1720_v24 = vsub.f32 %v1689_v34, %v1716_v27  ;;  %v2673_v34 = vld [vmem:[%s3745_s23 + $0x1] ss:$0 sm:$0xff] }
 0x476   : > { %v1726_v56 = vmul.f32 %v1722_v17, %v1722_v17  ;;  %v1724_v38 = vmul.f32 %v1720_v24, %v1720_v24 }
 0x478   : > { %1732 = vadd.xlane.f32.xlu0 %v1726_v56  ;;  %1728 = vadd.xlane.f32.xlu2 %v1724_v38 }
 0x479   : > { %v1715_v11 = vpop.xlane.xlu1 %1714  ;;  %v1711_v9 = vpop.xlane.xlu0 %1710 }
 0x47a   : > { %v1719_v22 = vmul.f32 %v1715_v11, %v3185_v28  ;;  %v1717_v25 = vmul.f32 %v1711_v9, %v3185_v28 }
 0x47c   : > { %v3664_v42 = vsub.f32 %v1696_v2, %v1719_v22  ;;  %v3666_v53 = vsub.f32 %v1691_v37, %v1717_v25 }
 0x47e   : > { %v1727_v40 = vmul.f32 %v3664_v42, %v3664_v42  ;;  %v1725_v51 = vmul.f32 %v3666_v53, %v3666_v53 }
 0x480   : > { %1734 = vadd.xlane.f32.xlu1 %v1727_v40  ;;  %1730 = vadd.xlane.f32.xlu2 %v1725_v51 }
 0x4eb   : > { %v1729_v26 = vpop.xlane.xlu2 %1728  ;;  %v1733_v30 = vpop.xlane.xlu0 %1732 }
 0x4ec   : > { %v1736_v58 = vmul.f32 %v1729_v26, %v3185_v28  ;;  %v1738_v20 = vmul.f32 %v1733_v30, %v3185_v28 }
 0x4ee   : > { %v1740_v29 = vadd.f32 1e-05, %v1736_v58  ;;  %v1742_v14 = vadd.f32 1e-05, %v1738_v20 }
 0x4f0   : > { %2674 = vrsqrt.f32 %v1740_v29  ;;  %vm1750_vm2 = vweird.f32 %v1740_v29  ;;  %vm1770_vm4 = vweird.f32 %v1742_v14 }
 0x4f1   : > { %2676 = vrsqrt.f32 %v1742_v14 }
 0x4f3   : > { %v1735_v1 = vpop.xlane.xlu1 %1734  ;;  %v1731_v45 = vpop.xlane.xlu2 %1730 }
 0x4f4   : > { %v1739_v3 = vmul.f32 %v1735_v1, %v3185_v28  ;;  %v1737_v35 = vmul.f32 %v1731_v45, %v3185_v28 }
 0x4f6   : > { %v2675_v61 = vpop.eup %2674  ;;  %v1743_v23 = vadd.f32 1e-05, %v1739_v3  ;;  %v1741_v46 = vadd.f32 1e-05, %v1737_v35 }
 0x4f7   : > { %v2677_v52 = vpop.eup %2676  ;;  %v1745_v48 = vmul.f32 %v2675_v61, %v1740_v29  ;;  %vm1751_vm0 = vweird.f32 %v2675_v61 }
 0x4f8   : > { %v1765_v49 = vmul.f32 %v2677_v52, %v1742_v14  ;;  %2678 = vrsqrt.f32 %v1743_v23  ;;  %vm1771_vm1 = vweird.f32 %v2677_v52  ;;  %vm1752_vm3 = vmor %vm1750_vm2, %vm1751_vm0  ;;  %vm1780_vm8 = vweird.f32 %v1743_v23 }
 0x4f9   : > { %v1746_v10 = vmul.f32 %v2675_v61, %v1745_v48  ;;  %2680 = vrsqrt.f32 %v1741_v46  ;;  %vm1772_vm5 = vmor %vm1770_vm4, %vm1771_vm1  ;;  %vm1760_vm10 = vweird.f32 %v1741_v46 }
 0x4fa   : > { %v1766_v50 = vmul.f32 %v2677_v52, %v1765_v49 }
 0x4fb   : > { %v1747_v54 = vmul.f32 0.5, %v1746_v10 }
 0x4fc   : > { %v1767_v57 = vmul.f32 0.5, %v1766_v50 }
 0x4fd   : > { %v1748_v63 = vsub.f32 1.5, %v1747_v54 }
 0x4fe   : > { %v2679_v39 = vpop.eup %2678  ;;  %v1768_v18 = vsub.f32 1.5, %v1767_v57 }
 0x4ff   : > { %v2681_v41 = vpop.eup %2680  ;;  %v1749_v32 = vmul.f32 %v2675_v61, %v1748_v63  ;;  %v1775_v28 = vmul.f32 %v2679_v39, %v1743_v23  ;;  %vm1781_vm6 = vweird.f32 %v2679_v39 }
 0x500   : > { %v1769_v13 = vmul.f32 %v2677_v52, %v1768_v18  ;;  %v1755_v0 = vmul.f32 %v2681_v41, %v1741_v46  ;;  %vm1761_vm7 = vweird.f32 %v2681_v41  ;;  %vm1782_vm9 = vmor %vm1780_vm8, %vm1781_vm6 }
 0x501   : > { %v1753_v8 = vsel %vm1752_vm3, %v2675_v61, %v1749_v32  ;;  %v1776_v19 = vmul.f32 %v2679_v39, %v1775_v28  ;;  %vm1762_vm11 = vmor %vm1760_vm10, %vm1761_vm7 }
 0x502   : > { %v1784_v4 = vmul.f32 %v1753_v8, %v1720_v24  ;;  %v1773_v6 = vsel %vm1772_vm5, %v2677_v52, %v1769_v13  ;;  %v1756_v7 = vmul.f32 %v2681_v41, %v1755_v0 }
 0x503   : > { %v1786_v36 = vmul.f32 %v1773_v6, %v1722_v17  ;;  %v1777_v21 = vmul.f32 0.5, %v1776_v19 }
 0x504   : > { %v1789_v37 = vmul.f32 %v2672_v33, %v1784_v4  ;;  %v1757_v59 = vmul.f32 0.5, %v1756_v7 }
 0x505   : > { %v1791_v60 = vmul.f32 %v2672_v33, %v1786_v36  ;;  %v1778_v31 = vsub.f32 1.5, %v1777_v21 }
 0x506   : > { %v1794_v43 = vadd.f32 %v2673_v34, %v1789_v37  ;;  %v1758_v47 = vsub.f32 1.5, %v1757_v59 }
 0x507   : > { %v1796_v44 = vadd.f32 %v2673_v34, %v1791_v60  ;;  %v1779_v5 = vmul.f32 %v2679_v39, %v1778_v31 }
 0x508   : > { %1798 = vst [vmem:[#allocation12] sm:$0xff] %v1794_v43  ;;  %v1759_v12 = vmul.f32 %v2681_v41, %v1758_v47 }
 0x509   : > { %1800 = vst [vmem:[#allocation12 + $0x10] sm:$0xff] %v1796_v44  ;;  %v1783_v55 = vsel %vm1782_vm9, %v2679_v39, %v1779_v5 }
 0x50a   : > { %v1787_v2 = vmul.f32 %v1783_v55, %v3664_v42  ;;  %v1763_v15 = vsel %vm1762_vm11, %v2681_v41, %v1759_v12 }
 0x50b   : > { %v1785_v62 = vmul.f32 %v1763_v15, %v3666_v53 }
 0x50c   : > { %v1792_v16 = vmul.f32 %v2672_v33, %v1787_v2 }
 0x50d   : > { %v1790_v27 = vmul.f32 %v2672_v33, %v1785_v62 }
 0x50e   : > { %v1797_v17 = vadd.f32 %v2673_v34, %v1792_v16 }
 0x50f   : > { %v1795_v24 = vadd.f32 %v2673_v34, %v1790_v27 }
 0x510   : > { %1801 = vst [vmem:[#allocation12 + $0x18] sm:$0xff] %v1797_v17 }
 0x511   : > { %1799 = vst [vmem:[#allocation12 + $0x8] sm:$0xff] %v1795_v24 }
 0x512 PF: > { %p2489_p3 = scmp.eq.s32.totalorder %s3047_s15, 1  ;;  %s3746_s4 = sld [smem:[#allocation26_spill]] }
 0x513   : > { %s2965_s28 = smov [#allocation12]   ;;  %s2966_s16 = smov 128  }
 0x514   : > { %s1810_s26 = sshll.u32 %s2965_s28, 4  ;;  %s2967_s19 = smov 8   ;;  %s1811_s26 = int_to_ptr.vmem [resolvable:$true] %s1810_s26 }
 0x518   : > { %s1812_s25 = sshll.u32 %s3746_s4, 4  ;;  %s1813_s25 = int_to_ptr.hbm [resolvable:$true] %s1812_s25 }
 0x519   : > { %2461 = dma.vmem_to_hbm [thread:$0]  (%p2489_p3), %s1811_s26, 512, %s1813_s25, [#allocation5], %s2966_s16, %s2966_s16, %s2967_s19  }
 0x51a   : > { %2927 = dma.done.wait (%p2489_p3), [#allocation5], 512  }
 0x51b   : > { %2929 = vsyncadd (%p2489_p3), [#allocation5], 4294966784 }
 0x51c PF: > { %s3747_s8 = sld [smem:[#allocation18_spill]]  ;;  %s3751_s30 = smov %s2936_s10 }
 0x51d   : > { %s3748_s0 = sld [smem:[#allocation17_spill]]  ;;  %s3753_s12 = smov %s2948_s13 }
 0x51e   : > { %s3749_s11 = sld [smem:[#allocation20_spill]] }
 0x51f   : > { %s3750_s15 = sld [smem:[#allocation19_spill]] }
 0x522   : > { %s22_s14 = sadd.s32 1, %s3747_s8  }
 0x523   : > { %p19_p4 = scmp.ge.s32.totalorder %s22_s14, 4   ;;  %s3752_s10 = smov %s3748_s0 }
 0x525   : > { %s3754_s13 = smov %s3750_s15  ;;  %21 = sbr.rel (!%p19_p4) target bundleno = 12 (0xc), region = 143 }
 0x52a   :  { %1829 = vsyncpa [#allocation4], 1 }
 0x52b   :  { %1831 = vsyncpa [#allocation4 + $0x1], 1 }
 0x52c   :  { %1832 = vsyncpa [#allocation7], 1 }
 0x52d   :  { %1833 = vsyncpa [#allocation5], 1 }
 0x52e   :  { %1835 = vsyncpa [#allocation5 + $0x1], 1 }

</bundles_post_ra>
